<compile_context>
chip_gen: v7x
topology: tpu7x:2x2x1
jax: 0.10.0
libtpu: 0.0.40
codegen_flags: <defaults>
</compile_context>

<pallas_src>
import jax
import jax.numpy as jnp
from jax import lax
from jax.experimental import pallas as pl
from jax.experimental.pallas import tpu as pltpu

NEG_SLOPE = 0.1
BN_EPS = 1e-5


def _leaky(v):
    return jnp.where(v >= 0, v, NEG_SLOPE * v)


# ----------------------------------------------------------------------------
# Fused kernel: folded-BN affine + all (leaky -> conv -> leaky -> conv -> +res)
# ----------------------------------------------------------------------------
def _make_kernel(kernels, C, L, left, pad_max):
    def kernel(x_ref, w_ref, v_ref, out_ref, xpad_ref, col_ref):
        # x_ref   : (1, C, L)    this grid step's batch element
        # w_ref   : (2*n_iter*C, k_max*C)   packed conv weights (im2col layout)
        # v_ref   : ((2+2*n_iter)*C, 1)     [bn_scale, bn_shift, b1_0, b2_0, ...]
        # out_ref : (1, C, L)
        # xpad_ref: (C, left + L + pad_max) padded staging buffer (VMEM scratch)
        # col_ref : (k_max*C, L)            im2col matrix          (VMEM scratch)

        scale = v_ref[pl.ds(0, C), :]                             # (C, 1)
        shift = v_ref[pl.ds(C, C), :]                             # (C, 1)

        # BatchNorm1d with the affine folded into scale/shift (computed once in
        # the wrapper from batch statistics; see waveform_res_conv_block).
        xb = x_ref[0] * scale + shift                             # (C, L)

        # Zero ONLY the halo strips of the staging buffer that padded reads
        # touch; the centre [left, left+L) is always overwritten before use.
        # Re-zero every grid step: under "parallel" semantics each TensorCore
        # has its own scratch instance, so a program_id==0 guard would be wrong.
        if pad_max > 0:
            zhalo = jnp.zeros((C, pad_max), jnp.float32)
            xpad_ref[:, pl.ds(left - pad_max, pad_max)] = zhalo
            xpad_ref[:, pl.ds(left + L, pad_max)] = zhalo

        def conv(h, idx, K):
            # h: (C, L).  PyTorch Conv1d (stride 1, padding=K//2) as an im2col
            # matmul:  out[co, l] = b[co] + sum_{k,ci} W[co,ci,k] * h_pad[ci, l+k]
            #   D[k*C + ci, l] = h_pad[ci, l - pad + k]
            pad = K // 2
            xpad_ref[:, pl.ds(left, L)] = h                       # 128-aligned store
            for k in range(K):
                col_ref[pl.ds(k * C, C), :] = xpad_ref[:, pl.ds(left - pad + k, L)]
            w = w_ref[pl.ds(idx * C, C), pl.ds(0, K * C)]         # (C, K*C)
            b = v_ref[pl.ds((2 + idx) * C, C), :]                 # (C, 1)
            dmat = col_ref[pl.ds(0, K * C), :]                    # (K*C, L)
            return jnp.dot(w, dmat, preferred_element_type=jnp.float32) + b

        for j, K in enumerate(kernels):
            h = conv(_leaky(xb), 2 * j, K)                        # blocks1[j]
            h = conv(_leaky(h), 2 * j + 1, K)                     # blocks2[j]
            xb = xb + h                                           # residual add

        out_ref[0] = xb                                           # lane-dense (C, L)

    return kernel


# ----------------------------------------------------------------------------
# Wrapper
# ----------------------------------------------------------------------------
def waveform_res_conv_block(x, params, kernels):
    """x: (B, C, L) float32 in the PyTorch NCL layout.  Returns (B, C, L)."""
    B, C, L = x.shape
    kernels = tuple(int(k) for k in kernels)
    n_iter = len(kernels)
    pad_max = max(k // 2 for k in kernels)
    k_max = max(kernels)
    # Activation sits at a 128-lane-aligned offset in the staging buffer so its
    # per-conv store is unmasked; halo reads shift it by at most pad_max lanes.
    left = ((pad_max + 127) // 128) * 128

    x = x.astype(jnp.float32)

    # ---- BatchNorm1d training-mode statistics (tiny XLA reduction, per review)
    # Folding scale/shift here removes the per-grid-step O(B^2) recompute and
    # lets each grid step DMA only its own batch element.
    mean = jnp.mean(x, axis=(0, 2))                               # (C,)
    var = jnp.mean(jnp.square(x - mean.reshape(1, C, 1)), axis=(0, 2))  # biased
    scale = params["gamma"].astype(jnp.float32) * lax.rsqrt(var + BN_EPS)
    shift = params["beta"].astype(jnp.float32) - mean * scale

    # ---- Pack parameters into two slabs (fewer tiny priming DMAs) -----------
    # Weight slab rows [idx*C, (idx+1)*C) hold conv idx = 2*j + t repacked to
    # the im2col layout  w2d[co, k*C + ci] = W[co, ci, k], zero-padded to k_max.
    w_rows = []
    v_rows = [scale.reshape(C, 1), shift.reshape(C, 1)]
    for j, K in enumerate(kernels):
        for tag in ("1", "2"):
            w = params[f"w{tag}_{j}"].astype(jnp.float32)         # (C, C, K) torch layout
            w2d = jnp.transpose(w, (0, 2, 1)).reshape(C, K * C)
            if K < k_max:
                w2d = jnp.pad(w2d, ((0, 0), (0, (k_max - K) * C)))
            w_rows.append(w2d)
            v_rows.append(params[f"b{tag}_{j}"].reshape(C, 1).astype(jnp.float32))
    w_slab = jnp.concatenate(w_rows, axis=0)                      # (2*n_iter*C, k_max*C)
    v_slab = jnp.concatenate(v_rows, axis=0)                      # ((2+2*n_iter)*C, 1)

    kernel = _make_kernel(kernels, C, L, left, pad_max)

    return pl.pallas_call(
        kernel,
        out_shape=jax.ShapeDtypeStruct((B, C, L), jnp.float32),
        grid=(B,),
        in_specs=[
            pl.BlockSpec((1, C, L), lambda b: (b, 0, 0)),         # this element only
            pl.BlockSpec(w_slab.shape, lambda b: (0, 0)),         # resident weights
            pl.BlockSpec(v_slab.shape, lambda b: (0, 0)),         # resident scale/shift/bias
        ],
        out_specs=pl.BlockSpec((1, C, L), lambda b: (b, 0, 0)),
        scratch_shapes=[
            pltpu.VMEM((C, left + L + pad_max), jnp.float32),     # padded staging
            pltpu.VMEM((k_max * C, L), jnp.float32),              # im2col matrix
        ],
        compiler_params=pltpu.CompilerParams(
            dimension_semantics=("parallel",),                    # both TCs on v7x
        ),
    )(x, w_slab, v_slab)


# ----------------------------------------------------------------------------
# Pure-JAX reference (mirrors the PyTorch module, training-mode BatchNorm)
# ----------------------------------------------------------------------------
def _torch_conv1d(x, w, b, pad):
    y = lax.conv_general_dilated(
        x, w, window_strides=(1,), padding=[(pad, pad)],
        dimension_numbers=("NCH", "OIH", "NCH"),
        precision=lax.Precision.HIGHEST)
    return y + b.reshape(1, -1, 1)


def reference_forward(x, params, kernels):
    B, C, L = x.shape
    mean = jnp.mean(x, axis=(0, 2), keepdims=True)
    var = jnp.mean((x - mean) ** 2, axis=(0, 2), keepdims=True)   # biased
    out = (x - mean) * lax.rsqrt(var + BN_EPS)
    out = out * params["gamma"].reshape(1, C, 1) + params["beta"].reshape(1, C, 1)
    for j, K in enumerate(kernels):
        pad = K // 2
        h = jnp.where(out >= 0, out, NEG_SLOPE * out)
        h = _torch_conv1d(h, params[f"w1_{j}"], params[f"b1_{j}"], pad)
        h = jnp.where(h >= 0, h, NEG_SLOPE * h)
        h = _torch_conv1d(h, params[f"w2_{j}"], params[f"b2_{j}"], pad)
        out = out + h
    return out


# ----------------------------------------------------------------------------
# Parameters (deterministic, synthetic, PyTorch layouts)
# ----------------------------------------------------------------------------
def init_params(C, kernels, key):
    keys = iter(jax.random.split(key, 64))

    def rnd(shape, scale=0.1):
        return scale * jax.random.normal(next(keys), shape, jnp.float32)

    p = {
        "gamma": 1.0 + rnd((C,)),
        "beta": rnd((C,)),
    }
    for j, K in enumerate(kernels):
        p[f"w1_{j}"] = rnd((C, C, K))      # torch Conv1d weight (C_out, C_in, K)
        p[f"b1_{j}"] = rnd((C,))
        p[f"w2_{j}"] = rnd((C, C, K))
        p[f"b2_{j}"] = rnd((C,))
    return p


# ----------------------------------------------------------------------------
if __name__ == "__main__":
    B, C, L = 2, 16, 256
    kernels = (3, 5, 7)

    key = jax.random.PRNGKey(0)
    kx, kp = jax.random.split(key)
    x = jax.random.normal(kx, (B, C, L), jnp.float32)
    params = init_params(C, kernels, kp)

    out = waveform_res_conv_block(x, params, kernels)
    out = jax.block_until_ready(out)
    assert out.shape == (B, C, L), out.shape
    assert bool(jnp.all(jnp.isfinite(out)))

    ref = jax.block_until_ready(reference_forward(x, params, kernels))
    max_err = float(jnp.max(jnp.abs(out - ref)))
    assert max_err < 2e-3, f"max abs err vs reference = {max_err}"

    print("KERNEL_OK")
</pallas_src>

<mosaic_0001>
module attributes {stable_mosaic.version = 11 : i64} {
  func.func @kernel(%arg0: i32, %arg1: memref<1x16x256xf32, #tpu.memory_space<vmem>>, %arg2: memref<96x112xf32, #tpu.memory_space<vmem>>, %arg3: memref<128x1xf32, #tpu.memory_space<vmem>>, %arg4: memref<1x16x256xf32, #tpu.memory_space<vmem>>, %arg5: memref<16x387xf32, #tpu.memory_space<vmem>>, %arg6: memref<112x256xf32, #tpu.memory_space<vmem>>) attributes {dimension_semantics = [#tpu.dimension_semantics<parallel>], iteration_bounds = array<i64: 2>, scalar_prefetch = 0 : i64, scratch_operands = 2 : i64, tpu.core_type = #tpu.core_type<tc>, window_params = [{transform_indices = @transform_0, window_bounds = array<i64: 1, 16, 256>}, {pipeline_mode = #tpu.pipeline_mode<synchronous>, transform_indices = @transform_1, window_bounds = array<i64: 96, 112>}, {pipeline_mode = #tpu.pipeline_mode<synchronous>, transform_indices = @transform_2, window_bounds = array<i64: 128, 1>}, {transform_indices = @transform_3, window_bounds = array<i64: 1, 16, 256>}]} {
    %c0 = arith.constant 0 : index
    %c0_0 = arith.constant 0 : index
    %0 = vector.load %arg3[%c0, %c0_0] : memref<128x1xf32, #tpu.memory_space<vmem>>, vector<16x1xf32>
    %c16 = arith.constant 16 : index
    %c0_1 = arith.constant 0 : index
    %1 = vector.load %arg3[%c16, %c0_1] : memref<128x1xf32, #tpu.memory_space<vmem>>, vector<16x1xf32>
    %c0_2 = arith.constant 0 : index
    %c0_3 = arith.constant 0 : index
    %c0_4 = arith.constant 0 : index
    %2 = vector.load %arg1[%c0_2, %c0_3, %c0_4] : memref<1x16x256xf32, #tpu.memory_space<vmem>>, vector<1x16x256xf32>
    %3 = vector.shape_cast %2 : vector<1x16x256xf32> to vector<16x256xf32>
    %4 = vector.broadcast %0 : vector<16x1xf32> to vector<16x256xf32>
    %5 = arith.mulf %3, %4 : vector<16x256xf32>
    %6 = vector.broadcast %1 : vector<16x1xf32> to vector<16x256xf32>
    %7 = arith.addf %5, %6 : vector<16x256xf32>
    %cst = arith.constant 0.000000e+00 : f32
    %8 = vector.broadcast %cst : f32 to vector<16x3xf32>
    %c0_5 = arith.constant 0 : index
    %c125 = arith.constant 125 : index
    %9 = vector.load %arg5[%c0_5, %c125] : memref<16x387xf32, #tpu.memory_space<vmem>>, vector<16x3xf32>
    tpu.vector_store %arg5[%c0_5, %c125], %8 {strides = array<i32>} : memref<16x387xf32, #tpu.memory_space<vmem>>, vector<16x3xf32>,
    %c0_6 = arith.constant 0 : index
    %c384 = arith.constant 384 : index
    %10 = vector.load %arg5[%c0_6, %c384] : memref<16x387xf32, #tpu.memory_space<vmem>>, vector<16x3xf32>
    tpu.vector_store %arg5[%c0_6, %c384], %8 {strides = array<i32>} : memref<16x387xf32, #tpu.memory_space<vmem>>, vector<16x3xf32>,
    %cst_7 = arith.constant 0.000000e+00 : f32
    %11 = vector.broadcast %cst_7 : f32 to vector<16x256xf32>
    %12 = arith.cmpf oge, %7, %11 : vector<16x256xf32>
    %cst_8 = arith.constant 1.000000e-01 : f32
    %13 = vector.broadcast %cst_8 : f32 to vector<16x256xf32>
    %14 = arith.mulf %13, %7 : vector<16x256xf32>
    %15 = arith.select %12, %7, %14 : vector<16x256xi1>, vector<16x256xf32>
    %c0_9 = arith.constant 0 : index
    %c128 = arith.constant 128 : index
    %16 = vector.load %arg5[%c0_9, %c128] : memref<16x387xf32, #tpu.memory_space<vmem>>, vector<16x256xf32>
    tpu.vector_store %arg5[%c0_9, %c128], %15 {strides = array<i32>} : memref<16x387xf32, #tpu.memory_space<vmem>>, vector<16x256xf32>,
    %c0_10 = arith.constant 0 : index
    %c127 = arith.constant 127 : index
    %17 = vector.load %arg5[%c0_10, %c127] : memref<16x387xf32, #tpu.memory_space<vmem>>, vector<16x256xf32>
    %c0_11 = arith.constant 0 : index
    %c0_12 = arith.constant 0 : index
    %18 = vector.load %arg6[%c0_11, %c0_12] : memref<112x256xf32, #tpu.memory_space<vmem>>, vector<16x256xf32>
    tpu.vector_store %arg6[%c0_11, %c0_12], %17 {strides = array<i32>} : memref<112x256xf32, #tpu.memory_space<vmem>>, vector<16x256xf32>,
    %c0_13 = arith.constant 0 : index
    %c128_14 = arith.constant 128 : index
    %19 = vector.load %arg5[%c0_13, %c128_14] : memref<16x387xf32, #tpu.memory_space<vmem>>, vector<16x256xf32>
    %c16_15 = arith.constant 16 : index
    %c0_16 = arith.constant 0 : index
    %20 = vector.load %arg6[%c16_15, %c0_16] : memref<112x256xf32, #tpu.memory_space<vmem>>, vector<16x256xf32>
    tpu.vector_store %arg6[%c16_15, %c0_16], %19 {strides = array<i32>} : memref<112x256xf32, #tpu.memory_space<vmem>>, vector<16x256xf32>,
    %c0_17 = arith.constant 0 : index
    %c129 = arith.constant 129 : index
    %21 = vector.load %arg5[%c0_17, %c129] : memref<16x387xf32, #tpu.memory_space<vmem>>, vector<16x256xf32>
    %c32 = arith.constant 32 : index
    %c0_18 = arith.constant 0 : index
    %22 = vector.load %arg6[%c32, %c0_18] : memref<112x256xf32, #tpu.memory_space<vmem>>, vector<16x256xf32>
    tpu.vector_store %arg6[%c32, %c0_18], %21 {strides = array<i32>} : memref<112x256xf32, #tpu.memory_space<vmem>>, vector<16x256xf32>,
    %c0_19 = arith.constant 0 : index
    %c0_20 = arith.constant 0 : index
    %23 = vector.load %arg2[%c0_19, %c0_20] : memref<96x112xf32, #tpu.memory_space<vmem>>, vector<16x48xf32>
    %c32_21 = arith.constant 32 : index
    %c0_22 = arith.constant 0 : index
    %24 = vector.load %arg3[%c32_21, %c0_22] : memref<128x1xf32, #tpu.memory_space<vmem>>, vector<16x1xf32>
    %c0_23 = arith.constant 0 : index
    %c0_24 = arith.constant 0 : index
    %25 = vector.load %arg6[%c0_23, %c0_24] : memref<112x256xf32, #tpu.memory_space<vmem>>, vector<48x256xf32>
    %cst_25 = arith.constant dense<0.000000e+00> : vector<16x256xf32>
    %26 = tpu.matmul %23, %25, %cst_25 {dimension_numbers = #tpu.dot_dimension_numbers<[1], [0], [0], [1], [0, 0, 1, 1], [], []>} : vector<16x48xf32>, vector<48x256xf32>, vector<16x256xf32> -> vector<16x256xf32>
    %27 = vector.broadcast %24 : vector<16x1xf32> to vector<16x256xf32>
    %28 = arith.addf %26, %27 : vector<16x256xf32>
    %cst_26 = arith.constant 0.000000e+00 : f32
    %29 = vector.broadcast %cst_26 : f32 to vector<16x256xf32>
    %30 = arith.cmpf oge, %28, %29 : vector<16x256xf32>
    %cst_27 = arith.constant 1.000000e-01 : f32
    %31 = vector.broadcast %cst_27 : f32 to vector<16x256xf32>
    %32 = arith.mulf %31, %28 : vector<16x256xf32>
    %33 = arith.select %30, %28, %32 : vector<16x256xi1>, vector<16x256xf32>
    %c0_28 = arith.constant 0 : index
    %c128_29 = arith.constant 128 : index
    %34 = vector.load %arg5[%c0_28, %c128_29] : memref<16x387xf32, #tpu.memory_space<vmem>>, vector<16x256xf32>
    tpu.vector_store %arg5[%c0_28, %c128_29], %33 {strides = array<i32>} : memref<16x387xf32, #tpu.memory_space<vmem>>, vector<16x256xf32>,
    %c0_30 = arith.constant 0 : index
    %c127_31 = arith.constant 127 : index
    %35 = vector.load %arg5[%c0_30, %c127_31] : memref<16x387xf32, #tpu.memory_space<vmem>>, vector<16x256xf32>
    %c0_32 = arith.constant 0 : index
    %c0_33 = arith.constant 0 : index
    %36 = vector.load %arg6[%c0_32, %c0_33] : memref<112x256xf32, #tpu.memory_space<vmem>>, vector<16x256xf32>
    tpu.vector_store %arg6[%c0_32, %c0_33], %35 {strides = array<i32>} : memref<112x256xf32, #tpu.memory_space<vmem>>, vector<16x256xf32>,
    %c0_34 = arith.constant 0 : index
    %c128_35 = arith.constant 128 : index
    %37 = vector.load %arg5[%c0_34, %c128_35] : memref<16x387xf32, #tpu.memory_space<vmem>>, vector<16x256xf32>
    %c16_36 = arith.constant 16 : index
    %c0_37 = arith.constant 0 : index
    %38 = vector.load %arg6[%c16_36, %c0_37] : memref<112x256xf32, #tpu.memory_space<vmem>>, vector<16x256xf32>
    tpu.vector_store %arg6[%c16_36, %c0_37], %37 {strides = array<i32>} : memref<112x256xf32, #tpu.memory_space<vmem>>, vector<16x256xf32>,
    %c0_38 = arith.constant 0 : index
    %c129_39 = arith.constant 129 : index
    %39 = vector.load %arg5[%c0_38, %c129_39] : memref<16x387xf32, #tpu.memory_space<vmem>>, vector<16x256xf32>
    %c32_40 = arith.constant 32 : index
    %c0_41 = arith.constant 0 : index
    %40 = vector.load %arg6[%c32_40, %c0_41] : memref<112x256xf32, #tpu.memory_space<vmem>>, vector<16x256xf32>
    tpu.vector_store %arg6[%c32_40, %c0_41], %39 {strides = array<i32>} : memref<112x256xf32, #tpu.memory_space<vmem>>, vector<16x256xf32>,
    %c16_42 = arith.constant 16 : index
    %c0_43 = arith.constant 0 : index
    %41 = vector.load %arg2[%c16_42, %c0_43] : memref<96x112xf32, #tpu.memory_space<vmem>>, vector<16x48xf32>
    %c48 = arith.constant 48 : index
    %c0_44 = arith.constant 0 : index
    %42 = vector.load %arg3[%c48, %c0_44] : memref<128x1xf32, #tpu.memory_space<vmem>>, vector<16x1xf32>
    %c0_45 = arith.constant 0 : index
    %c0_46 = arith.constant 0 : index
    %43 = vector.load %arg6[%c0_45, %c0_46] : memref<112x256xf32, #tpu.memory_space<vmem>>, vector<48x256xf32>
    %cst_47 = arith.constant dense<0.000000e+00> : vector<16x256xf32>
    %44 = tpu.matmul %41, %43, %cst_47 {dimension_numbers = #tpu.dot_dimension_numbers<[1], [0], [0], [1], [0, 0, 1, 1], [], []>} : vector<16x48xf32>, vector<48x256xf32>, vector<16x256xf32> -> vector<16x256xf32>
    %45 = vector.broadcast %42 : vector<16x1xf32> to vector<16x256xf32>
    %46 = arith.addf %44, %45 : vector<16x256xf32>
    %47 = arith.addf %7, %46 : vector<16x256xf32>
    %cst_48 = arith.constant 0.000000e+00 : f32
    %48 = vector.broadcast %cst_48 : f32 to vector<16x256xf32>
    %49 = arith.cmpf oge, %47, %48 : vector<16x256xf32>
    %cst_49 = arith.constant 1.000000e-01 : f32
    %50 = vector.broadcast %cst_49 : f32 to vector<16x256xf32>
    %51 = arith.mulf %50, %47 : vector<16x256xf32>
    %52 = arith.select %49, %47, %51 : vector<16x256xi1>, vector<16x256xf32>
    %c0_50 = arith.constant 0 : index
    %c128_51 = arith.constant 128 : index
    %53 = vector.load %arg5[%c0_50, %c128_51] : memref<16x387xf32, #tpu.memory_space<vmem>>, vector<16x256xf32>
    tpu.vector_store %arg5[%c0_50, %c128_51], %52 {strides = array<i32>} : memref<16x387xf32, #tpu.memory_space<vmem>>, vector<16x256xf32>,
    %c0_52 = arith.constant 0 : index
    %c126 = arith.constant 126 : index
    %54 = vector.load %arg5[%c0_52, %c126] : memref<16x387xf32, #tpu.memory_space<vmem>>, vector<16x256xf32>
    %c0_53 = arith.constant 0 : index
    %c0_54 = arith.constant 0 : index
    %55 = vector.load %arg6[%c0_53, %c0_54] : memref<112x256xf32, #tpu.memory_space<vmem>>, vector<16x256xf32>
    tpu.vector_store %arg6[%c0_53, %c0_54], %54 {strides = array<i32>} : memref<112x256xf32, #tpu.memory_space<vmem>>, vector<16x256xf32>,
    %c0_55 = arith.constant 0 : index
    %c127_56 = arith.constant 127 : index
    %56 = vector.load %arg5[%c0_55, %c127_56] : memref<16x387xf32, #tpu.memory_space<vmem>>, vector<16x256xf32>
    %c16_57 = arith.constant 16 : index
    %c0_58 = arith.constant 0 : index
    %57 = vector.load %arg6[%c16_57, %c0_58] : memref<112x256xf32, #tpu.memory_space<vmem>>, vector<16x256xf32>
    tpu.vector_store %arg6[%c16_57, %c0_58], %56 {strides = array<i32>} : memref<112x256xf32, #tpu.memory_space<vmem>>, vector<16x256xf32>,
    %c0_59 = arith.constant 0 : index
    %c128_60 = arith.constant 128 : index
    %58 = vector.load %arg5[%c0_59, %c128_60] : memref<16x387xf32, #tpu.memory_space<vmem>>, vector<16x256xf32>
    %c32_61 = arith.constant 32 : index
    %c0_62 = arith.constant 0 : index
    %59 = vector.load %arg6[%c32_61, %c0_62] : memref<112x256xf32, #tpu.memory_space<vmem>>, vector<16x256xf32>
    tpu.vector_store %arg6[%c32_61, %c0_62], %58 {strides = array<i32>} : memref<112x256xf32, #tpu.memory_space<vmem>>, vector<16x256xf32>,
    %c0_63 = arith.constant 0 : index
    %c129_64 = arith.constant 129 : index
    %60 = vector.load %arg5[%c0_63, %c129_64] : memref<16x387xf32, #tpu.memory_space<vmem>>, vector<16x256xf32>
    %c48_65 = arith.constant 48 : index
    %c0_66 = arith.constant 0 : index
    %61 = vector.load %arg6[%c48_65, %c0_66] : memref<112x256xf32, #tpu.memory_space<vmem>>, vector<16x256xf32>
    tpu.vector_store %arg6[%c48_65, %c0_66], %60 {strides = array<i32>} : memref<112x256xf32, #tpu.memory_space<vmem>>, vector<16x256xf32>,
    %c0_67 = arith.constant 0 : index
    %c130 = arith.constant 130 : index
    %62 = vector.load %arg5[%c0_67, %c130] : memref<16x387xf32, #tpu.memory_space<vmem>>, vector<16x256xf32>
    %c64 = arith.constant 64 : index
    %c0_68 = arith.constant 0 : index
    %63 = vector.load %arg6[%c64, %c0_68] : memref<112x256xf32, #tpu.memory_space<vmem>>, vector<16x256xf32>
    tpu.vector_store %arg6[%c64, %c0_68], %62 {strides = array<i32>} : memref<112x256xf32, #tpu.memory_space<vmem>>, vector<16x256xf32>,
    %c32_69 = arith.constant 32 : index
    %c0_70 = arith.constant 0 : index
    %64 = vector.load %arg2[%c32_69, %c0_70] : memref<96x112xf32, #tpu.memory_space<vmem>>, vector<16x80xf32>
    %c64_71 = arith.constant 64 : index
    %c0_72 = arith.constant 0 : index
    %65 = vector.load %arg3[%c64_71, %c0_72] : memref<128x1xf32, #tpu.memory_space<vmem>>, vector<16x1xf32>
    %c0_73 = arith.constant 0 : index
    %c0_74 = arith.constant 0 : index
    %66 = vector.load %arg6[%c0_73, %c0_74] : memref<112x256xf32, #tpu.memory_space<vmem>>, vector<80x256xf32>
    %cst_75 = arith.constant dense<0.000000e+00> : vector<16x256xf32>
    %67 = tpu.matmul %64, %66, %cst_75 {dimension_numbers = #tpu.dot_dimension_numbers<[1], [0], [0], [1], [0, 0, 1, 1], [], []>} : vector<16x80xf32>, vector<80x256xf32>, vector<16x256xf32> -> vector<16x256xf32>
    %68 = vector.broadcast %65 : vector<16x1xf32> to vector<16x256xf32>
    %69 = arith.addf %67, %68 : vector<16x256xf32>
    %cst_76 = arith.constant 0.000000e+00 : f32
    %70 = vector.broadcast %cst_76 : f32 to vector<16x256xf32>
    %71 = arith.cmpf oge, %69, %70 : vector<16x256xf32>
    %cst_77 = arith.constant 1.000000e-01 : f32
    %72 = vector.broadcast %cst_77 : f32 to vector<16x256xf32>
    %73 = arith.mulf %72, %69 : vector<16x256xf32>
    %74 = arith.select %71, %69, %73 : vector<16x256xi1>, vector<16x256xf32>
    %c0_78 = arith.constant 0 : index
    %c128_79 = arith.constant 128 : index
    %75 = vector.load %arg5[%c0_78, %c128_79] : memref<16x387xf32, #tpu.memory_space<vmem>>, vector<16x256xf32>
    tpu.vector_store %arg5[%c0_78, %c128_79], %74 {strides = array<i32>} : memref<16x387xf32, #tpu.memory_space<vmem>>, vector<16x256xf32>,
    %c0_80 = arith.constant 0 : index
    %c126_81 = arith.constant 126 : index
    %76 = vector.load %arg5[%c0_80, %c126_81] : memref<16x387xf32, #tpu.memory_space<vmem>>, vector<16x256xf32>
    %c0_82 = arith.constant 0 : index
    %c0_83 = arith.constant 0 : index
    %77 = vector.load %arg6[%c0_82, %c0_83] : memref<112x256xf32, #tpu.memory_space<vmem>>, vector<16x256xf32>
    tpu.vector_store %arg6[%c0_82, %c0_83], %76 {strides = array<i32>} : memref<112x256xf32, #tpu.memory_space<vmem>>, vector<16x256xf32>,
    %c0_84 = arith.constant 0 : index
    %c127_85 = arith.constant 127 : index
    %78 = vector.load %arg5[%c0_84, %c127_85] : memref<16x387xf32, #tpu.memory_space<vmem>>, vector<16x256xf32>
    %c16_86 = arith.constant 16 : index
    %c0_87 = arith.constant 0 : index
    %79 = vector.load %arg6[%c16_86, %c0_87] : memref<112x256xf32, #tpu.memory_space<vmem>>, vector<16x256xf32>
    tpu.vector_store %arg6[%c16_86, %c0_87], %78 {strides = array<i32>} : memref<112x256xf32, #tpu.memory_space<vmem>>, vector<16x256xf32>,
    %c0_88 = arith.constant 0 : index
    %c128_89 = arith.constant 128 : index
    %80 = vector.load %arg5[%c0_88, %c128_89] : memref<16x387xf32, #tpu.memory_space<vmem>>, vector<16x256xf32>
    %c32_90 = arith.constant 32 : index
    %c0_91 = arith.constant 0 : index
    %81 = vector.load %arg6[%c32_90, %c0_91] : memref<112x256xf32, #tpu.memory_space<vmem>>, vector<16x256xf32>
    tpu.vector_store %arg6[%c32_90, %c0_91], %80 {strides = array<i32>} : memref<112x256xf32, #tpu.memory_space<vmem>>, vector<16x256xf32>,
    %c0_92 = arith.constant 0 : index
    %c129_93 = arith.constant 129 : index
    %82 = vector.load %arg5[%c0_92, %c129_93] : memref<16x387xf32, #tpu.memory_space<vmem>>, vector<16x256xf32>
    %c48_94 = arith.constant 48 : index
    %c0_95 = arith.constant 0 : index
    %83 = vector.load %arg6[%c48_94, %c0_95] : memref<112x256xf32, #tpu.memory_space<vmem>>, vector<16x256xf32>
    tpu.vector_store %arg6[%c48_94, %c0_95], %82 {strides = array<i32>} : memref<112x256xf32, #tpu.memory_space<vmem>>, vector<16x256xf32>,
    %c0_96 = arith.constant 0 : index
    %c130_97 = arith.constant 130 : index
    %84 = vector.load %arg5[%c0_96, %c130_97] : memref<16x387xf32, #tpu.memory_space<vmem>>, vector<16x256xf32>
    %c64_98 = arith.constant 64 : index
    %c0_99 = arith.constant 0 : index
    %85 = vector.load %arg6[%c64_98, %c0_99] : memref<112x256xf32, #tpu.memory_space<vmem>>, vector<16x256xf32>
    tpu.vector_store %arg6[%c64_98, %c0_99], %84 {strides = array<i32>} : memref<112x256xf32, #tpu.memory_space<vmem>>, vector<16x256xf32>,
    %c48_100 = arith.constant 48 : index
    %c0_101 = arith.constant 0 : index
    %86 = vector.load %arg2[%c48_100, %c0_101] : memref<96x112xf32, #tpu.memory_space<vmem>>, vector<16x80xf32>
    %c80 = arith.constant 80 : index
    %c0_102 = arith.constant 0 : index
    %87 = vector.load %arg3[%c80, %c0_102] : memref<128x1xf32, #tpu.memory_space<vmem>>, vector<16x1xf32>
    %c0_103 = arith.constant 0 : index
    %c0_104 = arith.constant 0 : index
    %88 = vector.load %arg6[%c0_103, %c0_104] : memref<112x256xf32, #tpu.memory_space<vmem>>, vector<80x256xf32>
    %cst_105 = arith.constant dense<0.000000e+00> : vector<16x256xf32>
    %89 = tpu.matmul %86, %88, %cst_105 {dimension_numbers = #tpu.dot_dimension_numbers<[1], [0], [0], [1], [0, 0, 1, 1], [], []>} : vector<16x80xf32>, vector<80x256xf32>, vector<16x256xf32> -> vector<16x256xf32>
    %90 = vector.broadcast %87 : vector<16x1xf32> to vector<16x256xf32>
    %91 = arith.addf %89, %90 : vector<16x256xf32>
    %92 = arith.addf %47, %91 : vector<16x256xf32>
    %cst_106 = arith.constant 0.000000e+00 : f32
    %93 = vector.broadcast %cst_106 : f32 to vector<16x256xf32>
    %94 = arith.cmpf oge, %92, %93 : vector<16x256xf32>
    %cst_107 = arith.constant 1.000000e-01 : f32
    %95 = vector.broadcast %cst_107 : f32 to vector<16x256xf32>
    %96 = arith.mulf %95, %92 : vector<16x256xf32>
    %97 = arith.select %94, %92, %96 : vector<16x256xi1>, vector<16x256xf32>
    %c0_108 = arith.constant 0 : index
    %c128_109 = arith.constant 128 : index
    %98 = vector.load %arg5[%c0_108, %c128_109] : memref<16x387xf32, #tpu.memory_space<vmem>>, vector<16x256xf32>
    tpu.vector_store %arg5[%c0_108, %c128_109], %97 {strides = array<i32>} : memref<16x387xf32, #tpu.memory_space<vmem>>, vector<16x256xf32>,
    %c0_110 = arith.constant 0 : index
    %c125_111 = arith.constant 125 : index
    %99 = vector.load %arg5[%c0_110, %c125_111] : memref<16x387xf32, #tpu.memory_space<vmem>>, vector<16x256xf32>
    %c0_112 = arith.constant 0 : index
    %c0_113 = arith.constant 0 : index
    %100 = vector.load %arg6[%c0_112, %c0_113] : memref<112x256xf32, #tpu.memory_space<vmem>>, vector<16x256xf32>
    tpu.vector_store %arg6[%c0_112, %c0_113], %99 {strides = array<i32>} : memref<112x256xf32, #tpu.memory_space<vmem>>, vector<16x256xf32>,
    %c0_114 = arith.constant 0 : index
    %c126_115 = arith.constant 126 : index
    %101 = vector.load %arg5[%c0_114, %c126_115] : memref<16x387xf32, #tpu.memory_space<vmem>>, vector<16x256xf32>
    %c16_116 = arith.constant 16 : index
    %c0_117 = arith.constant 0 : index
    %102 = vector.load %arg6[%c16_116, %c0_117] : memref<112x256xf32, #tpu.memory_space<vmem>>, vector<16x256xf32>
    tpu.vector_store %arg6[%c16_116, %c0_117], %101 {strides = array<i32>} : memref<112x256xf32, #tpu.memory_space<vmem>>, vector<16x256xf32>,
    %c0_118 = arith.constant 0 : index
    %c127_119 = arith.constant 127 : index
    %103 = vector.load %arg5[%c0_118, %c127_119] : memref<16x387xf32, #tpu.memory_space<vmem>>, vector<16x256xf32>
    %c32_120 = arith.constant 32 : index
    %c0_121 = arith.constant 0 : index
    %104 = vector.load %arg6[%c32_120, %c0_121] : memref<112x256xf32, #tpu.memory_space<vmem>>, vector<16x256xf32>
    tpu.vector_store %arg6[%c32_120, %c0_121], %103 {strides = array<i32>} : memref<112x256xf32, #tpu.memory_space<vmem>>, vector<16x256xf32>,
    %c0_122 = arith.constant 0 : index
    %c128_123 = arith.constant 128 : index
    %105 = vector.load %arg5[%c0_122, %c128_123] : memref<16x387xf32, #tpu.memory_space<vmem>>, vector<16x256xf32>
    %c48_124 = arith.constant 48 : index
    %c0_125 = arith.constant 0 : index
    %106 = vector.load %arg6[%c48_124, %c0_125] : memref<112x256xf32, #tpu.memory_space<vmem>>, vector<16x256xf32>
    tpu.vector_store %arg6[%c48_124, %c0_125], %105 {strides = array<i32>} : memref<112x256xf32, #tpu.memory_space<vmem>>, vector<16x256xf32>,
    %c0_126 = arith.constant 0 : index
    %c129_127 = arith.constant 129 : index
    %107 = vector.load %arg5[%c0_126, %c129_127] : memref<16x387xf32, #tpu.memory_space<vmem>>, vector<16x256xf32>
    %c64_128 = arith.constant 64 : index
    %c0_129 = arith.constant 0 : index
    %108 = vector.load %arg6[%c64_128, %c0_129] : memref<112x256xf32, #tpu.memory_space<vmem>>, vector<16x256xf32>
    tpu.vector_store %arg6[%c64_128, %c0_129], %107 {strides = array<i32>} : memref<112x256xf32, #tpu.memory_space<vmem>>, vector<16x256xf32>,
    %c0_130 = arith.constant 0 : index
    %c130_131 = arith.constant 130 : index
    %109 = vector.load %arg5[%c0_130, %c130_131] : memref<16x387xf32, #tpu.memory_space<vmem>>, vector<16x256xf32>
    %c80_132 = arith.constant 80 : index
    %c0_133 = arith.constant 0 : index
    %110 = vector.load %arg6[%c80_132, %c0_133] : memref<112x256xf32, #tpu.memory_space<vmem>>, vector<16x256xf32>
    tpu.vector_store %arg6[%c80_132, %c0_133], %109 {strides = array<i32>} : memref<112x256xf32, #tpu.memory_space<vmem>>, vector<16x256xf32>,
    %c0_134 = arith.constant 0 : index
    %c131 = arith.constant 131 : index
    %111 = vector.load %arg5[%c0_134, %c131] : memref<16x387xf32, #tpu.memory_space<vmem>>, vector<16x256xf32>
    %c96 = arith.constant 96 : index
    %c0_135 = arith.constant 0 : index
    %112 = vector.load %arg6[%c96, %c0_135] : memref<112x256xf32, #tpu.memory_space<vmem>>, vector<16x256xf32>
    tpu.vector_store %arg6[%c96, %c0_135], %111 {strides = array<i32>} : memref<112x256xf32, #tpu.memory_space<vmem>>, vector<16x256xf32>,
    %c64_136 = arith.constant 64 : index
    %c0_137 = arith.constant 0 : index
    %113 = vector.load %arg2[%c64_136, %c0_137] : memref<96x112xf32, #tpu.memory_space<vmem>>, vector<16x112xf32>
    %c96_138 = arith.constant 96 : index
    %c0_139 = arith.constant 0 : index
    %114 = vector.load %arg3[%c96_138, %c0_139] : memref<128x1xf32, #tpu.memory_space<vmem>>, vector<16x1xf32>
    %c0_140 = arith.constant 0 : index
    %c0_141 = arith.constant 0 : index
    %115 = vector.load %arg6[%c0_140, %c0_141] : memref<112x256xf32, #tpu.memory_space<vmem>>, vector<112x256xf32>
    %cst_142 = arith.constant dense<0.000000e+00> : vector<16x256xf32>
    %116 = tpu.matmul %113, %115, %cst_142 {dimension_numbers = #tpu.dot_dimension_numbers<[1], [0], [0], [1], [0, 0, 1, 1], [], []>} : vector<16x112xf32>, vector<112x256xf32>, vector<16x256xf32> -> vector<16x256xf32>
    %117 = vector.broadcast %114 : vector<16x1xf32> to vector<16x256xf32>
    %118 = arith.addf %116, %117 : vector<16x256xf32>
    %cst_143 = arith.constant 0.000000e+00 : f32
    %119 = vector.broadcast %cst_143 : f32 to vector<16x256xf32>
    %120 = arith.cmpf oge, %118, %119 : vector<16x256xf32>
    %cst_144 = arith.constant 1.000000e-01 : f32
    %121 = vector.broadcast %cst_144 : f32 to vector<16x256xf32>
    %122 = arith.mulf %121, %118 : vector<16x256xf32>
    %123 = arith.select %120, %118, %122 : vector<16x256xi1>, vector<16x256xf32>
    %c0_145 = arith.constant 0 : index
    %c128_146 = arith.constant 128 : index
    %124 = vector.load %arg5[%c0_145, %c128_146] : memref<16x387xf32, #tpu.memory_space<vmem>>, vector<16x256xf32>
    tpu.vector_store %arg5[%c0_145, %c128_146], %123 {strides = array<i32>} : memref<16x387xf32, #tpu.memory_space<vmem>>, vector<16x256xf32>,
    %c0_147 = arith.constant 0 : index
    %c125_148 = arith.constant 125 : index
    %125 = vector.load %arg5[%c0_147, %c125_148] : memref<16x387xf32, #tpu.memory_space<vmem>>, vector<16x256xf32>
    %c0_149 = arith.constant 0 : index
    %c0_150 = arith.constant 0 : index
    %126 = vector.load %arg6[%c0_149, %c0_150] : memref<112x256xf32, #tpu.memory_space<vmem>>, vector<16x256xf32>
    tpu.vector_store %arg6[%c0_149, %c0_150], %125 {strides = array<i32>} : memref<112x256xf32, #tpu.memory_space<vmem>>, vector<16x256xf32>,
    %c0_151 = arith.constant 0 : index
    %c126_152 = arith.constant 126 : index
    %127 = vector.load %arg5[%c0_151, %c126_152] : memref<16x387xf32, #tpu.memory_space<vmem>>, vector<16x256xf32>
    %c16_153 = arith.constant 16 : index
    %c0_154 = arith.constant 0 : index
    %128 = vector.load %arg6[%c16_153, %c0_154] : memref<112x256xf32, #tpu.memory_space<vmem>>, vector<16x256xf32>
    tpu.vector_store %arg6[%c16_153, %c0_154], %127 {strides = array<i32>} : memref<112x256xf32, #tpu.memory_space<vmem>>, vector<16x256xf32>,
    %c0_155 = arith.constant 0 : index
    %c127_156 = arith.constant 127 : index
    %129 = vector.load %arg5[%c0_155, %c127_156] : memref<16x387xf32, #tpu.memory_space<vmem>>, vector<16x256xf32>
    %c32_157 = arith.constant 32 : index
    %c0_158 = arith.constant 0 : index
    %130 = vector.load %arg6[%c32_157, %c0_158] : memref<112x256xf32, #tpu.memory_space<vmem>>, vector<16x256xf32>
    tpu.vector_store %arg6[%c32_157, %c0_158], %129 {strides = array<i32>} : memref<112x256xf32, #tpu.memory_space<vmem>>, vector<16x256xf32>,
    %c0_159 = arith.constant 0 : index
    %c128_160 = arith.constant 128 : index
    %131 = vector.load %arg5[%c0_159, %c128_160] : memref<16x387xf32, #tpu.memory_space<vmem>>, vector<16x256xf32>
    %c48_161 = arith.constant 48 : index
    %c0_162 = arith.constant 0 : index
    %132 = vector.load %arg6[%c48_161, %c0_162] : memref<112x256xf32, #tpu.memory_space<vmem>>, vector<16x256xf32>
    tpu.vector_store %arg6[%c48_161, %c0_162], %131 {strides = array<i32>} : memref<112x256xf32, #tpu.memory_space<vmem>>, vector<16x256xf32>,
    %c0_163 = arith.constant 0 : index
    %c129_164 = arith.constant 129 : index
    %133 = vector.load %arg5[%c0_163, %c129_164] : memref<16x387xf32, #tpu.memory_space<vmem>>, vector<16x256xf32>
    %c64_165 = arith.constant 64 : index
    %c0_166 = arith.constant 0 : index
    %134 = vector.load %arg6[%c64_165, %c0_166] : memref<112x256xf32, #tpu.memory_space<vmem>>, vector<16x256xf32>
    tpu.vector_store %arg6[%c64_165, %c0_166], %133 {strides = array<i32>} : memref<112x256xf32, #tpu.memory_space<vmem>>, vector<16x256xf32>,
    %c0_167 = arith.constant 0 : index
    %c130_168 = arith.constant 130 : index
    %135 = vector.load %arg5[%c0_167, %c130_168] : memref<16x387xf32, #tpu.memory_space<vmem>>, vector<16x256xf32>
    %c80_169 = arith.constant 80 : index
    %c0_170 = arith.constant 0 : index
    %136 = vector.load %arg6[%c80_169, %c0_170] : memref<112x256xf32, #tpu.memory_space<vmem>>, vector<16x256xf32>
    tpu.vector_store %arg6[%c80_169, %c0_170], %135 {strides = array<i32>} : memref<112x256xf32, #tpu.memory_space<vmem>>, vector<16x256xf32>,
    %c0_171 = arith.constant 0 : index
    %c131_172 = arith.constant 131 : index
    %137 = vector.load %arg5[%c0_171, %c131_172] : memref<16x387xf32, #tpu.memory_space<vmem>>, vector<16x256xf32>
    %c96_173 = arith.constant 96 : index
    %c0_174 = arith.constant 0 : index
    %138 = vector.load %arg6[%c96_173, %c0_174] : memref<112x256xf32, #tpu.memory_space<vmem>>, vector<16x256xf32>
    tpu.vector_store %arg6[%c96_173, %c0_174], %137 {strides = array<i32>} : memref<112x256xf32, #tpu.memory_space<vmem>>, vector<16x256xf32>,
    %c80_175 = arith.constant 80 : index
    %c0_176 = arith.constant 0 : index
    %139 = vector.load %arg2[%c80_175, %c0_176] : memref<96x112xf32, #tpu.memory_space<vmem>>, vector<16x112xf32>
    %c112 = arith.constant 112 : index
    %c0_177 = arith.constant 0 : index
    %140 = vector.load %arg3[%c112, %c0_177] : memref<128x1xf32, #tpu.memory_space<vmem>>, vector<16x1xf32>
    %c0_178 = arith.constant 0 : index
    %c0_179 = arith.constant 0 : index
    %141 = vector.load %arg6[%c0_178, %c0_179] : memref<112x256xf32, #tpu.memory_space<vmem>>, vector<112x256xf32>
    %cst_180 = arith.constant dense<0.000000e+00> : vector<16x256xf32>
    %142 = tpu.matmul %139, %141, %cst_180 {dimension_numbers = #tpu.dot_dimension_numbers<[1], [0], [0], [1], [0, 0, 1, 1], [], []>} : vector<16x112xf32>, vector<112x256xf32>, vector<16x256xf32> -> vector<16x256xf32>
    %143 = vector.broadcast %140 : vector<16x1xf32> to vector<16x256xf32>
    %144 = arith.addf %142, %143 : vector<16x256xf32>
    %145 = arith.addf %92, %144 : vector<16x256xf32>
    %c0_181 = arith.constant 0 : index
    %c0_182 = arith.constant 0 : index
    %c0_183 = arith.constant 0 : index
    %146 = vector.load %arg4[%c0_181, %c0_182, %c0_183] : memref<1x16x256xf32, #tpu.memory_space<vmem>>, vector<1x16x256xf32>
    %147 = vector.shape_cast %146 : vector<1x16x256xf32> to vector<16x256xf32>
    %148 = vector.shape_cast %145 : vector<16x256xf32> to vector<1x16x256xf32>
    tpu.vector_store %arg4[%c0_181, %c0_182, %c0_183], %148 {strides = array<i32>} : memref<1x16x256xf32, #tpu.memory_space<vmem>>, vector<1x16x256xf32>,
    return
  }
  func.func @transform_0(%arg0: i32) -> (i32, i32, i32) {
    %c0_i32 = arith.constant 0 : i32
    %c0_i32_0 = arith.constant 0 : i32
    %c0_i32_1 = arith.constant 0 : i32
    return %arg0, %c0_i32, %c0_i32_0 : i32, i32, i32
  }
  func.func @transform_1(%arg0: i32) -> (i32, i32) {
    %c0_i32 = arith.constant 0 : i32
    %c0_i32_0 = arith.constant 0 : i32
    %c0_i32_1 = arith.constant 0 : i32
    return %c0_i32, %c0_i32_0 : i32, i32
  }
  func.func @transform_2(%arg0: i32) -> (i32, i32) {
    %c0_i32 = arith.constant 0 : i32
    %c0_i32_0 = arith.constant 0 : i32
    %c0_i32_1 = arith.constant 0 : i32
    return %c0_i32, %c0_i32_0 : i32, i32
  }
  func.func @transform_3(%arg0: i32) -> (i32, i32, i32) {
    %c0_i32 = arith.constant 0 : i32
    %c0_i32_0 = arith.constant 0 : i32
    %c0_i32_1 = arith.constant 0 : i32
    return %arg0, %c0_i32, %c0_i32_0 : i32, i32, i32
  }
}

</mosaic_0001>

<bundles_post_ra>
// kernel: tpu_custom_call.1
= control target key start
LH: loop header
LB: loop body
LE: loop exit
PB: predicated region body
PF: predicated region fallthrough
CT: control target
= control target key end

     0   :  { %8 = vsyncpa [#allocation5], 0  ;;  %s3423_s0 = inlined_call_operand.hbm [shape: f32[2,16,256], index: 0, kind: input, shape index: {}]   ;;  %s3424_s1 = inlined_call_operand.vmem [shape: f32[96,112], index: 1, kind: input, shape index: {}]   ;;  %s3425_s2 = inlined_call_operand.vmem [shape: f32[128,1], index: 2, kind: input, shape index: {}]   ;;  %s3426_s3 = inlined_call_operand.hbm [shape: f32[2,16,256], index: 3, kind: output, shape index: {}]  }
   0x1   :  { %10 = vsyncpa [#allocation5 + $0x1], 0 }
   0x2   :  { %11 = vsyncpa [#allocation6], 0 }
   0x3   :  { %13 = vsyncpa [#allocation6 + $0x1], 0  ;;  %s2752_s12 = smov 0   ;;  %s2754_s13 = smov 0  }
   0x4   :  { %s2756_s14 = smov 0   ;;  %s2758_s15 = smov 0  }
   0x5 LB: > { %s2773_s16 = sadd.s32 4294967295, %s2716_s15   ;;  %s2052_s17 = sadd.s32 4294967294, %s2716_s15   ;;  %s2716_s15 = sphi %s2758_s15, %s3439_s15   ;;  %s2712_s14 = sphi %s2756_s14, %s3438_s14   ;;  %s2708_s13 = sphi %s2754_s13, %s3437_s13   ;;  %s2704_s12 = sphi %s2752_s12, %s3436_s12  }
   0x6   : > { %s2777_s18 = sadd.s32 1, %s2716_s15   ;;  %s26_s19 = sadd.s32 1, %s2712_s14 }
   0x7   : > { %s23_s20 = ssub.s32 %s2716_s15, %s2777_s18  ;;  %p33_p0 = scmp.ne.s32.totalorder %s2712_s14, %s2708_s13 }
   0x8   : > { %p24_p1 = scmp.eq.s32.totalorder %s23_s20, 0  ;;  %p34_p2 = scmp.eq.s32.totalorder %s2716_s15, 0 }
   0x9   : > { %p39_p3 = scmp.ne.s32.totalorder %s2708_s13, %s2704_s12  ;;  %p40_p4 = scmp.eq.s32.totalorder %s2773_s16, 0 }
   0xa   : > { %s2789_s21 = scalar_select %p24_p1, %s2712_s14, %s26_s19  }
   0xb   : > { %p2791_p5 = por %p34_p2, %p33_p0  ;;  %p2795_p6 = por %p40_p4, %p39_p3 }
   0xc   : > { %p105_p7 = scmp.eq.s32.totalorder %s2773_s16, 1  ;;  %p111_p8 = scmp.eq.s32.totalorder %s2052_s17, 1 }
   0xd   : > { %p2212_p10 = scmp.lt.s32.totalorder %s2716_s15, 2  ;;  %s137_s26 = sand.u32 1, %s2712_s14  }
   0xe   : > { %p2802_p11 = por %p105_p7, %p33_p0  ;;  %p2806_p12 = por %p111_p8, %p39_p3 }
   0xf   : > { %s2078_s27 = sshll.u32 %s2716_s15, 9  ;;  %s2055_s28 = sshll.u32 %s137_s26, 5 }
  0x10   : > { %s3430_s24 = scalar_select %p2802_p11, 1, 0 }
  0x11   : > { %s3431_s25 = scalar_select %p2806_p12, 1, 0 }
  0x12   : > { %s2815_s4 = scalar_lea.hbm %s3423_s0, %s2078_s27  ;;  %s141_s5 = scalar_lea.vmem [#allocation4], %s2055_s28 }
  0x13   : > { %s148_s6 = sshll.u32 %s141_s5, 4  ;;  %p2819_p13 = pnand %p2212_p10, %p2791_p5  ;;  %s2823_s6 = int_to_ptr.vmem [resolvable:$true] %s148_s6 }
  0x14   : > { %s2825_s8 = scalar_lea.sflag [#allocation5], %s137_s26  ;;  %s2620_s9 = scalar_lea.hbm %s2815_s4, 512 }
  0x15   : > { %p2621_p0 = scmp.ne.s32.totalorder %s2815_s4, %s2620_s9  ;;  %p2622_p1 = pneg %p2819_p13 }
  0x16   : > { %s2625_s17 = scalar_lea.hbm %s3423_s0, 1024  ;;  %p2626_p4 = scmp.lt.u32.totalorder %s2815_s4, %s3423_s0 }
  0x17   : > { %p2623_p2 = pnand %p2622_p1, %p2621_p0  ;;  %p2627_p5 = scmp.lt.u32.totalorder %s2625_s17, %s2620_s9 }
  0x18   : > { %p2629_p8 = scmp.lt.u32.totalorder %s2620_s9, %s2815_s4 }
  0x19   : > { %p2624_p3 = pneg %p2623_p2  ;;  %p2628_p7 = por %p2627_p5, %p2626_p4 }
  0x1b   : > { %p2630_p10 = por %p2629_p8, %p2628_p7 }
  0x1d   : > { %p2631_p9 = pnand %p2630_p10, %p2624_p3 }
  0x1f   : > { %2634 = shalt.err (!%p2631_p9)
}
  0x20   : > { %s2635_s22 = scalar_lea.vmem %s2823_s6, 512  ;;  %s2718_s26 = smov [#allocation4]  }
  0x21   : > { %p2636_p0 = scmp.ne.s32.totalorder %s2823_s6, %s2635_s22  ;;  %s2640_s27 = sshll.u32 %s2718_s26, 4  ;;  %s2641_s27 = int_to_ptr.vmem [resolvable:$false] %s2640_s27 }
  0x22   : > { %s2642_s28 = scalar_lea.vmem %s2641_s27, 1024  ;;  %p2643_p11 = scmp.lt.s32.totalorder %s2823_s6, %s2641_s27 }
  0x23   : > { %p2638_p2 = pnand %p2636_p0, %p2622_p1  ;;  %p2644_p4 = scmp.lt.s32.totalorder %s2642_s28, %s2635_s22 }
  0x25   : > { %p2639_p12 = pneg %p2638_p2  ;;  %p2645_p5 = por %p2644_p4, %p2643_p11 }
  0x27   : > { %p2646_p7 = pnand %p2645_p5, %p2639_p12 }
  0x29   : > { %2649 = shalt.err (!%p2646_p7)
}
  0x2a   : > { %s2719_s29 = smov 256   ;;  %s2720_s30 = smov 16  }
  0x2b   : > { %2207 = dma.hbm_to_vmem [thread:$0]  (!%p2819_p13), %s2815_s4, 512, %s2823_s6, %s2825_s8, %s2719_s29, %s2719_s29, %s2720_s30  }
  0x2c   : > { %p2058_p9 = scmp.ge.s32.totalorder %s2716_s15, 1  ;;  %p156_p1 = scmp.lt.s32.totalorder %s2716_s15, 3 }
  0x2e   : > { %p157_p3 = pnand %p2058_p9, %p156_p1 }
  0x2f   : > { %s2856_s5 = sand.u32 (!%p157_p3), 1, %s2708_s13  }
  0x30   : > { %160 = sbr.rel (%p157_p3) target bundleno = 2412 (0x96c), region = 32  ;;  %s2059_s9 = sshll.u32 (!%p157_p3), %s2856_s5, 5 }
  0x31   : > { %s163_s10 = scalar_lea.sflag (!%p157_p3), [#allocation5], %s2856_s5  ;;  %s2862_s11 = scalar_lea.vmem (!%p157_p3), [#allocation4], %s2059_s9 }
  0x37   : > { %2695 = dma.done.wait (%p2795_p6), %s163_s10, 512  }
  0x38   : > { %2697 = vsyncadd (%p2795_p6), %s163_s10, 4294966784  ;;  %v2721_v0 = vmov 0   ;;  %v191_v1 = vld [vmem:[%s3425_s2 + $0x10] sm:$0xff]  ;;  %v189_v2 = vld [vmem:[%s3425_s2] sm:$0xff]  ;;  %vm228_vm0 = vcmask 23552   ;;  %v2722_v3 = vmov 0.0  }
  0x39   : > { %2259 = vset.pattern.permute.xlu1 %v2721_v0  ;;  %2258 = vset.pattern.permute.xlu0 %v2721_v0  ;;  %230 = vst.msk [vmem:[#allocation2 + $0x38] sm:$0xff] %vm228_vm0, %v2722_v3  ;;  %229 = vst.msk [vmem:[#allocation2 + $0x18] sm:$0xff] %vm228_vm0, %v2722_v3  ;;  %v192_v4 = vld [vmem:[%s3425_s2 + $0x18] sm:$0xff]  ;;  %v190_v5 = vld [vmem:[%s3425_s2 + $0x8] sm:$0xff]  ;;  %vm225_vm1 = vcmask 1048552   ;;  %s2723_s22 = smov 1  }
  0x3a   : > { %213 = vperm.xlu1 %2259, %v191_v1   ;;  %199 = vperm.xlu0 %2258, %v189_v2   ;;  %226 = vst.msk [vmem:[#allocation2] sm:$0xff] %vm225_vm1, %v2722_v3  ;;  %227 = vst.msk [vmem:[#allocation2 + $0x20] sm:$0xff] %vm225_vm1, %v2722_v3  ;;  %v193_v6 = vld [vmem:[%s2862_s11] sm:$0xff]  ;;  %v194_v7 = vld [vmem:[%s2862_s11 + $0x8] sm:$0xff]  ;;  %s2724_s26 = smov 127   ;;  %vm271_vm6 = vcmask 7168  }
  0x3b   : > { %426 = vmatprep.mubr.f32.mxu0 %v2722_v3  ;;  %631 = vmatprep.mubr.f32.mxu1 %v2722_v3  ;;  %v195_v14 = vld [vmem:[%s2862_s11 + $0x10] sm:$0xff]  ;;  %v196_v15 = vld [vmem:[%s2862_s11 + $0x18] sm:$0xff]  ;;  %v331_v41 = vld [vmem:[%s3425_s2 + $0x20] sm:$0xff]  ;;  %vm316_vm7 = vcmask 1039360   ;;  %vm355_vm8 = vcmask 392192   ;;  %s2725_s29 = smov 2  }
  0x3c   : > { %v332_v43 = vld [vmem:[%s3425_s2 + $0x28] sm:$0xff]  ;;  %s2726_s30 = smov 126   ;;  %s2727_s7 = smov 3  }
  0x3d   : > { %s2728_s8 = smov 125   ;;  %s188_s23 = scalar_lea.vmem [#allocation7], %s2059_s9 }
  0x3e   : > { %218 = vperm.xlu1 %2259, %v192_v4   ;;  %204 = vperm.xlu0 %2258, %v190_v5   ;;  %s1979_s17 = sshll.u32 %s188_s23, 4  ;;  %s2079_s19 = sshll.u32 %s2773_s16, 9  ;;  %s3372_s17 = int_to_ptr.vmem [resolvable:$true] %s1979_s17 }
  0x3f   : > { %s3378_s27 = scalar_lea.hbm %s3426_s3, %s2079_s19  ;;  %s1966_s16 = scalar_lea.sflag [#allocation6], %s2856_s5 }
  0x40   : > { %v2918_v35 = vld [vmem:[#allocation2 + $0x38] sm:$0xff]  ;;  %s2650_s28 = scalar_lea.vmem %s3372_s17, 512  ;;  %p3433_p11 = scmp.ne.s32.totalorder %s3430_s24, 0 }
  0x41   : > { %v247_v21 = vld [vmem:[#allocation2] sm:$0xff]  ;;  %v2922_v37 = vld [vmem:[#allocation2 + $0x18] sm:$0xff]  ;;  %p2651_p6 = scmp.ne.s32.totalorder %s3372_s17, %s2650_s28  ;;  %s2729_s10 = smov [#allocation7]  }
  0x42   : > { %v250_v22 = vld [vmem:[#allocation2 + $0x20] sm:$0xff]  ;;  %s2654_s11 = sshll.u32 %s2729_s10, 4  ;;  %s2655_s11 = int_to_ptr.vmem [resolvable:$false] %s2654_s11 }
  0x43   : > { %v2909_v29 = vpack.i.bf16 %v250_v22, %v247_v21  ;;  %p2652_p12 = pnand %p2651_p6, %p3433_p11  ;;  %p2657_p8 = scmp.lt.s32.totalorder %s3372_s17, %s2655_s11 }
  0x45   : > { %p2653_p13 = pneg %p2652_p12 }
  0xb9   : > { %v200_v8 = vpop.permute.xlu0 %199  ;;  %v214_v9 = vpop.permute.xlu1 %213 }
  0xba   : > { %v207_v10 = vmul.f32 %v200_v8, %v193_v6  ;;  %v208_v11 = vmul.f32 %v200_v8, %v194_v7 }
  0xbc   : > { %v2890_v12 = vadd.f32 %v214_v9, %v207_v10  ;;  %v2892_v13 = vadd.f32 %v214_v9, %v208_v11  ;;  %v329_v11 = vld [vmem:[%s3424_s1] sm:$0xff] }
  0xbd   : > { %v205_v16 = vpop.permute.xlu0 %204  ;;  %v219_v25 = vpop.permute.xlu1 %218 }
  0xbe   : > { %vm231_vm2 = vcmp.ge.f32.partialorder %v2890_v12, 0.0  ;;  %vm232_vm3 = vcmp.ge.f32.partialorder %v2892_v13, 0.0  ;;  %v235_v17 = vmul.f32 0.1, %v2890_v12  ;;  %v236_v18 = vmul.f32 0.1, %v2892_v13 }
  0xbf   : > { %v209_v19 = vmul.f32 %v205_v16, %v195_v14  ;;  %v210_v20 = vmul.f32 %v205_v16, %v196_v15  ;;  %v330_v14 = vld [vmem:[%s3424_s1 + $0x8] sm:$0xff] }
  0xc0   : > { %v2901_v23 = vsel %vm231_vm2, %v2890_v12, %v235_v17  ;;  %v240_v24 = vsel %vm232_vm3, %v2892_v13, %v236_v18  ;;  %vm688_vm2 = vcmask 15360   ;;  %vm805_vm3 = vcmask 1031168  }
  0xc1   : > { %v2904_v26 = vadd.f32 %v219_v25, %v209_v19  ;;  %v2906_v27 = vadd.f32 %v219_v25, %v210_v20  ;;  %v2260_v28 = vpack.i.bf16 %v240_v24, %v2901_v23  ;;  %v2275_v40 = vpack.i.bf16 %v2922_v37, %v240_v24 }
  0xc3   : > { %vm233_vm4 = vcmp.ge.f32.partialorder %v2904_v26, 0.0  ;;  %vm234_vm5 = vcmp.ge.f32.partialorder %v2906_v27, 0.0  ;;  %v237_v30 = vmul.f32 0.1, %v2904_v26  ;;  %v238_v31 = vmul.f32 0.1, %v2906_v27  ;;  %2261 = vrot.lane.b32.xlu0 %v2260_v28, %s2723_s22 }
  0xc5   : > { %v241_v32 = vsel %vm233_vm4, %v2904_v26, %v237_v30  ;;  %v242_v33 = vsel %vm234_vm5, %v2906_v27, %v238_v31  ;;  %vm852_vm4 = vcmask 654336  }
  0xc6   : > { %v2265_v34 = vpack.i.bf16 %v242_v33, %v241_v32  ;;  %v2084_v36 = vpack.c.bf16 %v242_v33, %v240_v24  ;;  %v2086_v38 = vpack.c.bf16 %v241_v32, %v2901_v23  ;;  %v2280_v39 = vpack.i.bf16 %v2918_v35, %v242_v33 }
  0xc7   : > { %2271 = vrot.lane.b32.xlu0 %v2909_v29, %s2723_s22  ;;  %v2285_v42 = vpack.i.bf16 %v241_v32, %v2901_v23 }
  0xc8   : > { %2266 = vrot.lane.b32.xlu1 %v2265_v34, %s2723_s22 }
  0xcb   : > { %2281 = vrot.lane.b32.xlu0 %v2280_v39, %s2724_s26 }
  0xcc   : > { %2276 = vrot.lane.b32.xlu1 %v2275_v40, %s2724_s26 }
  0xcf   : > { %347 = vperm.xlu0 %2258, %v331_v41  }
  0xd0   : > { %2286 = vrot.lane.b32.xlu1 %v2285_v42, %s2724_s26 }
  0xd4   : > { %352 = vperm.xlu1 %2259, %v332_v43  }
 0x135   : > { %v2262_v44 = vpop.permute.xlu0 %2261 }
 0x136   : > { %v2264_v45 = vunpack.i.h.bf16 %v2262_v44  ;;  %v2263_v46 = vunpack.i.l.bf16 %v2262_v44 }
 0x138   : > { %v273_v55 = vsel %vm271_vm6, %v2263_v46, %v2264_v45  ;;  %v537_v45 = vld [vmem:[%s3425_s2 + $0x30] sm:$0xff] }
 0x139   : > { %v2272_v47 = vpop.permute.xlu0 %2271 }
 0x13a   : > { %v2267_v48 = vpop.permute.xlu1 %2266  ;;  %v2274_v49 = vunpack.i.h.bf16 %v2272_v47  ;;  %v2273_v50 = vunpack.i.l.bf16 %v2272_v47 }
 0x13b   : > { %v2269_v51 = vunpack.i.h.bf16 %v2267_v48  ;;  %v2268_v52 = vunpack.i.l.bf16 %v2267_v48 }
 0x13c   : > { %v272_v53 = vsel %vm271_vm6, %v2273_v50, %v2263_v46  ;;  %v538_v46 = vld [vmem:[%s3425_s2 + $0x38] sm:$0xff] }
 0x13d   : > { %v2282_v54 = vpop.permute.xlu0 %2281  ;;  %v275_v56 = vsel %vm271_vm6, %v2268_v52, %v2269_v51  ;;  %v274_v57 = vsel %vm271_vm6, %v2274_v49, %v2268_v52 }
 0x13e   : > { %v2277_v58 = vpop.permute.xlu1 %2276  ;;  %v2284_v59 = vunpack.i.h.bf16 %v2282_v54  ;;  %v2283_v60 = vunpack.i.l.bf16 %v2282_v54  ;;  %v2080_v61 = vpack.c.bf16 %v275_v56, %v273_v55  ;;  %v2082_v62 = vpack.c.bf16 %v274_v57, %v272_v53 }
 0x13f   : > { %v2279_v63 = vunpack.i.h.bf16 %v2277_v58  ;;  %v2278_v0 = vunpack.i.l.bf16 %v2277_v58 }
 0x140   : > { %2081 = vmatprep.subr.bf16.mxu0 %v2080_v61  ;;  %v320_v2 = vsel %vm316_vm7, %v2283_v60, %v2284_v59 }
 0x141   : > { %2083 = vmatpush1.bf16.msra.mxu0 %v2082_v62  ;;  %v318_v1 = vsel %vm316_vm7, %v2278_v0, %v2279_v63 }
 0x142   : > { %v2287_v4 = vpop.permute.xlu1 %2286  ;;  %2085 = vmatprep.subr.bf16.mxu0 %v2084_v36  ;;  %v2088_v7 = vpack.c.bf16 %v320_v2, %v318_v1 }
 0x143   : > { %v2289_v5 = vunpack.i.h.bf16 %v2287_v4  ;;  %v2288_v6 = vunpack.i.l.bf16 %v2287_v4 }
 0x145   : > { %2087 = vmatpush1.bf16.msra.mxu0 %v2086_v38  ;;  %v317_v8 = vsel %vm316_vm7, %v2288_v6, %v2278_v0  ;;  %v319_v9 = vsel %vm316_vm7, %v2289_v5, %v2283_v60 }
 0x146   : > { %2089 = vmatprep.subr.bf16.mxu0 %v2088_v7  ;;  %v2090_v10 = vpack.c.bf16 %v319_v9, %v317_v8 }
 0x149   : > { %2091 = vmatpush1.bf16.msra.mxu0 %v2090_v10 }
 0x14c   : > { %2061 = vmatmul.mubr.msk.f32.vlgmr.msra.gmra.mrb[0].mxu0 %vm355_vm8, %v329_v11 }
 0x14d   : > { %432 = vmatprep.mubr.f32.mxu0 %v2722_v3 }
 0x14e   : > { %v348_v15 = vpop.permute.xlu0 %347 }
 0x150   : > { %2062 = vmatmul.mubr.msk.f32.gmra.mrb[2].mxu0 %vm355_vm8, %v330_v14 }
 0x151   : > { %923 = vmatprep.mubr.f32.mxu0 %v2722_v3 }
 0x153   : > { %v353_v21 = vpop.permute.xlu1 %352 }
 0x21f   : > { %v428_v16 = vpop.f32.mrb[0].mxu0 }
 0x220   : > { %v429_v17 = vadd.f32 %v428_v16, %v348_v15  ;;  %v430_v18 = vpop.f32.mrb[1].mxu0  ;;  %v535_v16 = vld [vmem:[%s3424_s1 + $0x10] sm:$0xff] }
 0x221   : > { %v431_v19 = vadd.f32 %v430_v18, %v348_v15 }
 0x222   : > { %vm439_vm9 = vcmp.ge.f32.partialorder %v429_v17, 0.0  ;;  %v443_v20 = vmul.f32 0.1, %v429_v17 }
 0x223   : > { %vm440_vm10 = vcmp.ge.f32.partialorder %v431_v19, 0.0  ;;  %v444_v22 = vmul.f32 0.1, %v431_v19  ;;  %v434_v23 = vpop.f32.mrb[2].mxu0 }
 0x224   : > { %v447_v24 = vsel %vm439_vm9, %v429_v17, %v443_v20  ;;  %v435_v25 = vadd.f32 %v434_v23, %v353_v21  ;;  %v436_v28 = vpop.f32.mrb[3].mxu0  ;;  %v536_v17 = vld [vmem:[%s3424_s1 + $0x18] sm:$0xff] }
 0x225   : > { %v448_v30 = vsel %vm440_vm10, %v431_v19, %v444_v22  ;;  %v437_v31 = vadd.f32 %v436_v28, %v353_v21 }
 0x226   : > { %vm441_vm11 = vcmp.ge.f32.partialorder %v435_v25, 0.0  ;;  %v445_v32 = vmul.f32 0.1, %v435_v25  ;;  %v2290_v33 = vpack.i.bf16 %v448_v30, %v447_v24  ;;  %v2305_v43 = vpack.i.bf16 %v2922_v37, %v448_v30 }
 0x227   : > { %vm442_vm12 = vcmp.ge.f32.partialorder %v437_v31, 0.0  ;;  %v446_v34 = vmul.f32 0.1, %v437_v31 }
 0x228   : > { %v449_v36 = vsel %vm441_vm11, %v435_v25, %v445_v32  ;;  %2291 = vrot.lane.b32.xlu0 %v2290_v33, %s2723_s22 }
 0x229   : > { %v450_v38 = vsel %vm442_vm12, %v437_v31, %v446_v34  ;;  %v2315_v39 = vpack.i.bf16 %v449_v36, %v447_v24  ;;  %v2098_v40 = vpack.c.bf16 %v449_v36, %v447_v24 }
 0x22a   : > { %v2295_v41 = vpack.i.bf16 %v450_v38, %v449_v36  ;;  %v2096_v42 = vpack.c.bf16 %v450_v38, %v448_v30  ;;  %v2310_v44 = vpack.i.bf16 %v2918_v35, %v450_v38 }
 0x22c   : > { %2296 = vrot.lane.b32.xlu1 %v2295_v41, %s2723_s22  ;;  %2301 = vrot.lane.b32.xlu0 %v2909_v29, %s2723_s22 }
 0x230   : > { %2306 = vrot.lane.b32.xlu1 %v2305_v43, %s2724_s26  ;;  %2311 = vrot.lane.b32.xlu0 %v2310_v44, %s2724_s26 }
 0x234   : > { %2316 = vrot.lane.b32.xlu1 %v2315_v39, %s2724_s26  ;;  %553 = vperm.xlu0 %2258, %v537_v45  }
 0x238   : > { %558 = vperm.xlu1 %2259, %v538_v46   ;;  %2321 = vrot.lane.b32.xlu0 %v2909_v29, %s2725_s29 }
 0x29a   : > { %v2292_v47 = vpop.permute.xlu0 %2291 }
 0x29b   : > { %v2294_v48 = vunpack.i.h.bf16 %v2292_v47  ;;  %v2293_v49 = vunpack.i.l.bf16 %v2292_v47 }
 0x29d   : > { %v480_v56 = vsel %vm271_vm6, %v2293_v49, %v2294_v48  ;;  %v820_v48 = vld [vmem:[%s3425_s2 + $0x40] sm:$0xff] }
 0x29e   : > { %v2297_v50 = vpop.permute.xlu1 %2296  ;;  %v2302_v51 = vpop.permute.xlu0 %2301 }
 0x29f   : > { %v2299_v52 = vunpack.i.h.bf16 %v2297_v50  ;;  %v2298_v53 = vunpack.i.l.bf16 %v2297_v50  ;;  %v2304_v54 = vunpack.i.h.bf16 %v2302_v51  ;;  %v2303_v55 = vunpack.i.l.bf16 %v2302_v51 }
 0x2a1   : > { %v482_v57 = vsel %vm271_vm6, %v2298_v53, %v2299_v52  ;;  %v479_v58 = vsel %vm271_vm6, %v2303_v55, %v2293_v49  ;;  %v481_v59 = vsel %vm271_vm6, %v2304_v54, %v2298_v53  ;;  %v821_v49 = vld [vmem:[%s3425_s2 + $0x48] sm:$0xff] }
 0x2a2   : > { %v2307_v60 = vpop.permute.xlu1 %2306  ;;  %v2312_v61 = vpop.permute.xlu0 %2311  ;;  %v2092_v62 = vpack.c.bf16 %v482_v57, %v480_v56  ;;  %v2094_v63 = vpack.c.bf16 %v481_v59, %v479_v58 }
 0x2a3   : > { %v2309_v0 = vunpack.i.h.bf16 %v2307_v60  ;;  %v2308_v1 = vunpack.i.l.bf16 %v2307_v60  ;;  %v2314_v2 = vunpack.i.h.bf16 %v2312_v61  ;;  %v2313_v4 = vunpack.i.l.bf16 %v2312_v61 }
 0x2a4   : > { %2093 = vmatprep.subr.bf16.mxu1 %v2092_v62 }
 0x2a5   : > { %2095 = vmatpush1.bf16.msra.mxu1 %v2094_v63  ;;  %v524_v5 = vsel %vm316_vm7, %v2308_v1, %v2309_v0  ;;  %v526_v6 = vsel %vm316_vm7, %v2313_v4, %v2314_v2 }
 0x2a6   : > { %v2317_v7 = vpop.permute.xlu1 %2316  ;;  %2097 = vmatprep.subr.bf16.mxu1 %v2096_v42  ;;  %v2100_v10 = vpack.c.bf16 %v526_v6, %v524_v5 }
 0x2a7   : > { %v2319_v8 = vunpack.i.h.bf16 %v2317_v7  ;;  %v2318_v9 = vunpack.i.l.bf16 %v2317_v7 }
 0x2a9   : > { %2099 = vmatpush1.bf16.msra.mxu1 %v2098_v40  ;;  %v523_v11 = vsel %vm316_vm7, %v2318_v9, %v2308_v1  ;;  %v525_v14 = vsel %vm316_vm7, %v2319_v8, %v2313_v4 }
 0x2aa   : > { %2101 = vmatprep.subr.bf16.mxu1 %v2100_v10  ;;  %v2102_v15 = vpack.c.bf16 %v525_v14, %v523_v11 }
 0x2ad   : > { %2103 = vmatpush1.bf16.msra.mxu1 %v2102_v15 }
 0x2b0   : > { %2063 = vmatmul.mubr.msk.f32.vlgmr.msra.gmra.mrb[0].mxu1 %vm355_vm8, %v535_v16 }
 0x2b1   : > { %637 = vmatprep.mubr.f32.mxu1 %v2722_v3 }
 0x2b3   : > { %v554_v18 = vpop.permute.xlu0 %553 }
 0x2b4   : > { %2064 = vmatmul.mubr.msk.f32.gmra.mrb[2].mxu1 %vm355_vm8, %v536_v17 }
 0x2b5   : > { %1208 = vmatprep.mubr.f32.mxu1 %v2722_v3 }
 0x2b7   : > { %v559_v24 = vpop.permute.xlu1 %558  ;;  %v2322_v50 = vpop.permute.xlu0 %2321 }
 0x2b8   : > { %v2323_v52 = vunpack.i.l.bf16 %v2322_v50  ;;  %v2324_v55 = vunpack.i.h.bf16 %v2322_v50 }
 0x383   : > { %v633_v19 = vpop.f32.mrb[0].mxu1 }
 0x384   : > { %v634_v20 = vadd.f32 %v633_v19, %v554_v18  ;;  %v635_v21 = vpop.f32.mrb[1].mxu1 }
 0x385   : > { %v636_v22 = vadd.f32 %v635_v21, %v554_v18 }
 0x386   : > { %v2992_v23 = vadd.f32 %v634_v20, %v2890_v12 }
 0x387   : > { %v2995_v25 = vadd.f32 %v636_v22, %v2892_v13  ;;  %v639_v28 = vpop.f32.mrb[2].mxu1 }
 0x388   : > { %vm648_vm13 = vcmp.ge.f32.partialorder %v2992_v23, 0.0  ;;  %v652_v30 = vmul.f32 0.1, %v2992_v23  ;;  %v640_v31 = vadd.f32 %v639_v28, %v559_v24  ;;  %v641_v32 = vpop.f32.mrb[3].mxu1 }
 0x389   : > { %vm649_vm14 = vcmp.ge.f32.partialorder %v2995_v25, 0.0  ;;  %v653_v33 = vmul.f32 0.1, %v2995_v25  ;;  %v642_v34 = vadd.f32 %v641_v32, %v559_v24 }
 0x38a   : > { %v3002_v36 = vsel %vm648_vm13, %v2992_v23, %v652_v30  ;;  %v3005_v12 = vadd.f32 %v640_v31, %v2904_v26 }
 0x38b   : > { %v3008_v13 = vsel %vm649_vm14, %v2995_v25, %v653_v33  ;;  %v3011_v38 = vadd.f32 %v642_v34, %v2906_v27 }
 0x38c   : > { %vm650_vm15 = vcmp.ge.f32.partialorder %v3005_v12, 0.0  ;;  %v654_v39 = vmul.f32 0.1, %v3005_v12  ;;  %v2325_v40 = vpack.i.bf16 %v3008_v13, %v3002_v36  ;;  %v2350_v45 = vpack.i.bf16 %v2922_v37, %v3008_v13 }
 0x38d   : > { %vm651_vm1 = vcmp.ge.f32.partialorder %v3011_v38, 0.0  ;;  %v655_v41 = vmul.f32 0.1, %v3011_v38 }
 0x38e   : > { %v3020_v26 = vsel %vm650_vm15, %v3005_v12, %v654_v39  ;;  %2326 = vrot.lane.b32.xlu0 %v2325_v40, %s2725_s29  ;;  %vm1453_vm15 = vcmask 1022976  }
 0x38f   : > { %v3024_v42 = vsel %vm651_vm1, %v3011_v38, %v655_v41  ;;  %v2114_v27 = vpack.c.bf16 %v3020_v26, %v3002_v36  ;;  %v2355_v46 = vpack.i.bf16 %v3020_v26, %v3002_v36  ;;  %vm1508_vm1 = vcmask 916480  }
 0x390   : > { %v2330_v43 = vpack.i.bf16 %v3024_v42, %v3020_v26  ;;  %v2112_v44 = vpack.c.bf16 %v3024_v42, %v3008_v13  ;;  %v2360_v47 = vpack.i.bf16 %v2918_v35, %v3024_v42  ;;  %v818_v26 = vld [vmem:[%s3424_s1 + $0x20] sm:$0xff] }
 0x392   : > { %2331 = vrot.lane.b32.xlu1 %v2330_v43, %s2725_s29  ;;  %2346 = vrot.lane.b32.xlu0 %v2330_v43, %s2723_s22 }
 0x396   : > { %2336 = vrot.lane.b32.xlu1 %v2325_v40, %s2723_s22  ;;  %2351 = vrot.lane.b32.xlu0 %v2350_v45, %s2724_s26 }
 0x39a   : > { %2341 = vrot.lane.b32.xlu1 %v2909_v29, %s2723_s22  ;;  %2356 = vrot.lane.b32.xlu0 %v2355_v46, %s2724_s26 }
 0x39e   : > { %2361 = vrot.lane.b32.xlu1 %v2360_v47, %s2724_s26  ;;  %2371 = vrot.lane.b32.xlu0 %v2360_v47, %s2726_s30 }
 0x3a2   : > { %2366 = vrot.lane.b32.xlu1 %v2350_v45, %s2726_s30  ;;  %844 = vperm.xlu0 %2258, %v820_v48  }
 0x3a6   : > { %2376 = vrot.lane.b32.xlu1 %v2355_v46, %s2726_s30  ;;  %2381 = vrot.lane.b32.xlu0 %v2909_v29, %s2725_s29 }
 0x3aa   : > { %849 = vperm.xlu1 %2259, %v821_v49  }
 0x400   : > { %v2327_v51 = vpop.permute.xlu0 %2326 }
 0x401   : > { %v2329_v53 = vunpack.i.h.bf16 %v2327_v51  ;;  %v2328_v54 = vunpack.i.l.bf16 %v2327_v51 }
 0x403   : > { %v689_v60 = vsel %vm688_vm2, %v2323_v52, %v2328_v54  ;;  %v690_v61 = vsel %vm688_vm2, %v2328_v54, %v2329_v53 }
 0x404   : > { %v2332_v56 = vpop.permute.xlu1 %2331  ;;  %v2347_v57 = vpop.permute.xlu0 %2346 }
 0x405   : > { %v2334_v58 = vunpack.i.h.bf16 %v2332_v56  ;;  %v2333_v59 = vunpack.i.l.bf16 %v2332_v56  ;;  %v2349_v63 = vunpack.i.h.bf16 %v2347_v57  ;;  %v2348_v0 = vunpack.i.l.bf16 %v2347_v57 }
 0x407   : > { %v691_v62 = vsel %vm688_vm2, %v2324_v55, %v2333_v59  ;;  %v692_v1 = vsel %vm688_vm2, %v2333_v59, %v2334_v58  ;;  %v728_v10 = vsel %vm271_vm6, %v2348_v0, %v2349_v63 }
 0x408   : > { %v2106_v2 = vpack.c.bf16 %v691_v62, %v689_v60  ;;  %v2337_v4 = vpop.permute.xlu1 %2336  ;;  %v2352_v5 = vpop.permute.xlu0 %2351  ;;  %v2104_v6 = vpack.c.bf16 %v692_v1, %v690_v61 }
 0x409   : > { %v2339_v7 = vunpack.i.h.bf16 %v2337_v4  ;;  %v2338_v8 = vunpack.i.l.bf16 %v2337_v4  ;;  %v2354_v18 = vunpack.i.h.bf16 %v2352_v5  ;;  %v2353_v19 = vunpack.i.l.bf16 %v2352_v5 }
 0x40a   : > { %2105 = vmatprep.subr.bf16.mxu0 %v2104_v6 }
 0x40b   : > { %2107 = vmatpush1.bf16.msra.mxu0 %v2106_v2  ;;  %v726_v9 = vsel %vm271_vm6, %v2338_v8, %v2339_v7  ;;  %v770_v33 = vsel %vm316_vm7, %v2353_v19, %v2354_v18 }
 0x40c   : > { %v2342_v11 = vpop.permute.xlu1 %2341  ;;  %v2357_v14 = vpop.permute.xlu0 %2356  ;;  %v2108_v15 = vpack.c.bf16 %v728_v10, %v726_v9 }
 0x40d   : > { %v2344_v16 = vunpack.i.h.bf16 %v2342_v11  ;;  %v2343_v17 = vunpack.i.l.bf16 %v2342_v11  ;;  %v2359_v32 = vunpack.i.h.bf16 %v2357_v14  ;;  %v2358_v34 = vunpack.i.l.bf16 %v2357_v14 }
 0x40e   : > { %2109 = vmatprep.subr.bf16.mxu0 %v2108_v15 }
 0x40f   : > { %v725_v20 = vsel %vm271_vm6, %v2343_v17, %v2338_v8  ;;  %v727_v21 = vsel %vm271_vm6, %v2344_v16, %v2348_v0  ;;  %v769_v49 = vsel %vm316_vm7, %v2358_v34, %v2353_v19 }
 0x410   : > { %v2110_v22 = vpack.c.bf16 %v727_v21, %v725_v20  ;;  %v2362_v24 = vpop.permute.xlu1 %2361  ;;  %v2372_v28 = vpop.permute.xlu0 %2371 }
 0x411   : > { %v2364_v30 = vunpack.i.h.bf16 %v2362_v24  ;;  %v2363_v31 = vunpack.i.l.bf16 %v2362_v24  ;;  %v2374_v39 = vunpack.i.h.bf16 %v2372_v28  ;;  %v2373_v40 = vunpack.i.l.bf16 %v2372_v28 }
 0x412   : > { %2111 = vmatpush1.bf16.msra.mxu0 %v2110_v22 }
 0x413   : > { %2113 = vmatprep.subr.bf16.mxu0 %v2112_v44  ;;  %v772_v41 = vsel %vm316_vm7, %v2363_v31, %v2364_v30  ;;  %v771_v46 = vsel %vm316_vm7, %v2359_v32, %v2363_v31  ;;  %v809_v13 = vsel %vm805_vm3, %v2373_v40, %v2374_v39 }
 0x414   : > { %v2367_v43 = vpop.permute.xlu1 %2366  ;;  %v2116_v45 = vpack.c.bf16 %v772_v41, %v770_v33  ;;  %v2118_v42 = vpack.c.bf16 %v771_v46, %v769_v49 }
 0x415   : > { %v2369_v47 = vunpack.i.h.bf16 %v2367_v43  ;;  %v2368_v48 = vunpack.i.l.bf16 %v2367_v43 }
 0x416   : > { %2115 = vmatpush1.bf16.msra.mxu0 %v2114_v27  ;;  %v819_v27 = vld [vmem:[%s3424_s1 + $0x28] sm:$0xff] }
 0x417   : > { %2117 = vmatprep.subr.bf16.mxu0 %v2116_v45  ;;  %v807_v50 = vsel %vm805_vm3, %v2368_v48, %v2369_v47 }
 0x418   : > { %v2377_v44 = vpop.permute.xlu1 %2376  ;;  %v2120_v51 = vpack.c.bf16 %v809_v13, %v807_v50 }
 0x419   : > { %v2379_v52 = vunpack.i.h.bf16 %v2377_v44  ;;  %v2378_v53 = vunpack.i.l.bf16 %v2377_v44 }
 0x41a   : > { %2119 = vmatpush1.bf16.msra.mxu0 %v2118_v42 }
 0x41b   : > { %v806_v54 = vsel %vm805_vm3, %v2378_v53, %v2368_v48  ;;  %v808_v55 = vsel %vm805_vm3, %v2379_v52, %v2373_v40  ;;  %2121 = vmatprep.subr.bf16.mxu0 %v2120_v51 }
 0x41c   : > { %v2122_v36 = vpack.c.bf16 %v808_v55, %v806_v54 }
 0x41e   : > { %2123 = vmatpush1.bf16.msra.mxu0 %v2122_v36 }
 0x421   : > { %2065 = vmatmul.mubr.msk.f32.vlgmr.msra.gmra.mrb[4].mxu0 %vm852_vm4, %v818_v26  ;;  %v845_v56 = vpop.permute.xlu0 %844 }
 0x422   : > { %929 = vmatprep.mubr.f32.mxu0 %v2722_v3 }
 0x425   : > { %2066 = vmatmul.mubr.msk.f32.gmra.mrb[6].mxu0 %vm852_vm4, %v819_v27  ;;  %v2382_v20 = vpop.permute.xlu0 %2381 }
 0x426   : > { %1579 = vmatprep.mubr.f32.mxu0 %v2722_v3  ;;  %v2383_v21 = vunpack.i.l.bf16 %v2382_v20  ;;  %v2384_v28 = vunpack.i.h.bf16 %v2382_v20 }
 0x429   : > { %v850_v62 = vpop.permute.xlu1 %849 }
 0x4f4   : > { %v925_v57 = vpop.f32.mrb[4].mxu0 }
 0x4f5   : > { %v926_v58 = vadd.f32 %v925_v57, %v845_v56  ;;  %v927_v59 = vpop.f32.mrb[5].mxu0 }
 0x4f6   : > { %v928_v60 = vadd.f32 %v927_v59, %v845_v56 }
 0x4f7   : > { %vm936_vm5 = vcmp.ge.f32.partialorder %v926_v58, 0.0  ;;  %v940_v61 = vmul.f32 0.1, %v926_v58 }
 0x4f8   : > { %vm937_vm8 = vcmp.ge.f32.partialorder %v928_v60, 0.0  ;;  %v941_v63 = vmul.f32 0.1, %v928_v60  ;;  %v931_v0 = vpop.f32.mrb[6].mxu0 }
 0x4f9   : > { %v3089_v1 = vsel %vm936_vm5, %v926_v58, %v940_v61  ;;  %v932_v2 = vadd.f32 %v931_v0, %v850_v62  ;;  %v933_v4 = vpop.f32.mrb[7].mxu0 }
 0x4fa   : > { %v3091_v5 = vsel %vm937_vm8, %v928_v60, %v941_v63  ;;  %v934_v6 = vadd.f32 %v933_v4, %v850_v62 }
 0x4fb   : > { %vm938_vm9 = vcmp.ge.f32.partialorder %v932_v2, 0.0  ;;  %v942_v7 = vmul.f32 0.1, %v932_v2  ;;  %v2385_v8 = vpack.i.bf16 %v3091_v5, %v3089_v1  ;;  %v2410_v18 = vpack.i.bf16 %v2922_v37, %v3091_v5  ;;  %v1106_v37 = vld [vmem:[%s3425_s2 + $0x50] sm:$0xff] }
 0x4fc   : > { %vm939_vm10 = vcmp.ge.f32.partialorder %v934_v6, 0.0  ;;  %v943_v9 = vmul.f32 0.1, %v934_v6 }
 0x4fd   : > { %v3095_v10 = vsel %vm938_vm9, %v932_v2, %v942_v7  ;;  %2386 = vrot.lane.b32.xlu0 %v2385_v8, %s2725_s29 }
 0x4fe   : > { %v3098_v11 = vsel %vm939_vm10, %v934_v6, %v943_v9  ;;  %v2415_v14 = vpack.i.bf16 %v3095_v10, %v3089_v1  ;;  %v2134_v15 = vpack.c.bf16 %v3095_v10, %v3089_v1 }
 0x4ff   : > { %v2390_v16 = vpack.i.bf16 %v3098_v11, %v3095_v10  ;;  %v2132_v17 = vpack.c.bf16 %v3098_v11, %v3091_v5  ;;  %v2420_v19 = vpack.i.bf16 %v2918_v35, %v3098_v11  ;;  %v1104_v10 = vld [vmem:[%s3424_s1 + $0x30] sm:$0xff] }
 0x501   : > { %2391 = vrot.lane.b32.xlu1 %v2390_v16, %s2725_s29  ;;  %2406 = vrot.lane.b32.xlu0 %v2390_v16, %s2723_s22 }
 0x505   : > { %2396 = vrot.lane.b32.xlu1 %v2385_v8, %s2723_s22  ;;  %2411 = vrot.lane.b32.xlu0 %v2410_v18, %s2724_s26 }
 0x509   : > { %2401 = vrot.lane.b32.xlu1 %v2909_v29, %s2723_s22  ;;  %2416 = vrot.lane.b32.xlu0 %v2415_v14, %s2724_s26  ;;  %v1107_v29 = vld [vmem:[%s3425_s2 + $0x58] sm:$0xff] }
 0x50d   : > { %2421 = vrot.lane.b32.xlu1 %v2420_v19, %s2724_s26  ;;  %2431 = vrot.lane.b32.xlu0 %v2420_v19, %s2726_s30 }
 0x511   : > { %2426 = vrot.lane.b32.xlu1 %v2410_v18, %s2726_s30  ;;  %1130 = vperm.xlu0 %2258, %v1106_v37  }
 0x515   : > { %2436 = vrot.lane.b32.xlu1 %v2415_v14, %s2726_s30 }
 0x519   : > { %1135 = vperm.xlu1 %2259, %v1107_v29  }
 0x56f   : > { %v2387_v35 = vpop.permute.xlu0 %2386 }
 0x570   : > { %v2389_v22 = vunpack.i.h.bf16 %v2387_v35  ;;  %v2388_v24 = vunpack.i.l.bf16 %v2387_v35 }
 0x572   : > { %v976_v34 = vsel %vm688_vm2, %v2383_v21, %v2388_v24  ;;  %v977_v39 = vsel %vm688_vm2, %v2388_v24, %v2389_v22  ;;  %v1241_v22 = vld [vmem:[#allocation2] sm:$0xff] }
 0x573   : > { %v2392_v30 = vpop.permute.xlu1 %2391  ;;  %v2407_v31 = vpop.permute.xlu0 %2406  ;;  %v1244_v24 = vld [vmem:[#allocation2 + $0x20] sm:$0xff] }
 0x574   : > { %v2394_v32 = vunpack.i.h.bf16 %v2392_v30  ;;  %v2393_v33 = vunpack.i.l.bf16 %v2392_v30  ;;  %v2409_v41 = vunpack.i.h.bf16 %v2407_v31  ;;  %v2408_v43 = vunpack.i.l.bf16 %v2407_v31 }
 0x576   : > { %v978_v40 = vsel %vm688_vm2, %v2384_v28, %v2393_v33  ;;  %v979_v45 = vsel %vm688_vm2, %v2393_v33, %v2394_v32  ;;  %v1015_v44 = vsel %vm271_vm6, %v2408_v43, %v2409_v41  ;;  %v3161_v28 = vpack.i.bf16 %v1244_v24, %v1241_v22 }
 0x577   : > { %v2126_v46 = vpack.c.bf16 %v978_v40, %v976_v34  ;;  %v2397_v47 = vpop.permute.xlu1 %2396  ;;  %v2412_v48 = vpop.permute.xlu0 %2411  ;;  %v2124_v49 = vpack.c.bf16 %v979_v45, %v977_v39 }
 0x578   : > { %v2399_v50 = vunpack.i.h.bf16 %v2397_v47  ;;  %v2398_v13 = vunpack.i.l.bf16 %v2397_v47  ;;  %v2414_v36 = vunpack.i.h.bf16 %v2412_v48  ;;  %v2413_v26 = vunpack.i.l.bf16 %v2412_v48  ;;  %2441 = vrot.lane.b32.xlu0 %v3161_v28, %s2727_s7 }
 0x579   : > { %2125 = vmatprep.subr.bf16.mxu1 %v2124_v49 }
 0x57a   : > { %2127 = vmatpush1.bf16.msra.mxu1 %v2126_v46  ;;  %v1013_v42 = vsel %vm271_vm6, %v2398_v13, %v2399_v50  ;;  %v1057_v63 = vsel %vm316_vm7, %v2413_v26, %v2414_v36 }
 0x57b   : > { %v2402_v51 = vpop.permute.xlu1 %2401  ;;  %v2417_v52 = vpop.permute.xlu0 %2416  ;;  %v2128_v53 = vpack.c.bf16 %v1015_v44, %v1013_v42 }
 0x57c   : > { %v2404_v54 = vunpack.i.h.bf16 %v2402_v51  ;;  %v2403_v55 = vunpack.i.l.bf16 %v2402_v51  ;;  %v2419_v62 = vunpack.i.h.bf16 %v2417_v52  ;;  %v2418_v0 = vunpack.i.l.bf16 %v2417_v52 }
 0x57d   : > { %2129 = vmatprep.subr.bf16.mxu1 %v2128_v53 }
 0x57e   : > { %v1012_v27 = vsel %vm271_vm6, %v2403_v55, %v2398_v13  ;;  %v1014_v56 = vsel %vm271_vm6, %v2404_v54, %v2408_v43  ;;  %v1056_v18 = vsel %vm316_vm7, %v2418_v0, %v2413_v26  ;;  %v3212_v55 = vld [vmem:[#allocation2 + $0x18] sm:$0xff] }
 0x57f   : > { %v2130_v57 = vpack.c.bf16 %v1014_v56, %v1012_v27  ;;  %v2422_v58 = vpop.permute.xlu1 %2421  ;;  %v2432_v59 = vpop.permute.xlu0 %2431  ;;  %v3219_v26 = vld [vmem:[#allocation2 + $0x38] sm:$0xff] }
 0x580   : > { %v2424_v60 = vunpack.i.h.bf16 %v2422_v58  ;;  %v2423_v61 = vunpack.i.l.bf16 %v2422_v58  ;;  %v2434_v2 = vunpack.i.h.bf16 %v2432_v59  ;;  %v2433_v4 = vunpack.i.l.bf16 %v2432_v59  ;;  %v1469_v58 = vld [vmem:[%s3425_s2 + $0x68] sm:$0xff] }
 0x581   : > { %2131 = vmatpush1.bf16.msra.mxu1 %v2130_v57  ;;  %v1468_v57 = vld [vmem:[%s3425_s2 + $0x60] sm:$0xff] }
 0x582   : > { %2133 = vmatprep.subr.bf16.mxu1 %v2132_v17  ;;  %v1059_v6 = vsel %vm316_vm7, %v2423_v61, %v2424_v60  ;;  %v1058_v9 = vsel %vm316_vm7, %v2419_v62, %v2423_v61  ;;  %v1095_v5 = vsel %vm805_vm3, %v2433_v4, %v2434_v2 }
 0x583   : > { %v2427_v7 = vpop.permute.xlu1 %2426  ;;  %v2136_v8 = vpack.c.bf16 %v1059_v6, %v1057_v63  ;;  %v2138_v11 = vpack.c.bf16 %v1058_v9, %v1056_v18 }
 0x584   : > { %v2429_v14 = vunpack.i.h.bf16 %v2427_v7  ;;  %v2428_v16 = vunpack.i.l.bf16 %v2427_v7 }
 0x585   : > { %2135 = vmatpush1.bf16.msra.mxu1 %v2134_v15  ;;  %v1105_v15 = vld [vmem:[%s3424_s1 + $0x38] sm:$0xff] }
 0x586   : > { %2137 = vmatprep.subr.bf16.mxu1 %v2136_v8  ;;  %v1093_v19 = vsel %vm805_vm3, %v2428_v16, %v2429_v14 }
 0x587   : > { %v2437_v17 = vpop.permute.xlu1 %2436  ;;  %v2140_v37 = vpack.c.bf16 %v1095_v5, %v1093_v19 }
 0x588   : > { %v2439_v29 = vunpack.i.h.bf16 %v2437_v17  ;;  %v2438_v20 = vunpack.i.l.bf16 %v2437_v17 }
 0x589   : > { %2139 = vmatpush1.bf16.msra.mxu1 %v2138_v11 }
 0x58a   : > { %v1092_v35 = vsel %vm805_vm3, %v2438_v20, %v2428_v16  ;;  %v1094_v21 = vsel %vm805_vm3, %v2439_v29, %v2433_v4  ;;  %2141 = vmatprep.subr.bf16.mxu1 %v2140_v37 }
 0x58b   : > { %v2142_v1 = vpack.c.bf16 %v1094_v21, %v1092_v35 }
 0x58d   : > { %2143 = vmatpush1.bf16.msra.mxu1 %v2142_v1 }
 0x590   : > { %2067 = vmatmul.mubr.msk.f32.vlgmr.msra.gmra.mrb[4].mxu1 %vm852_vm4, %v1104_v10  ;;  %v1131_v30 = vpop.permute.xlu0 %1130 }
 0x591   : > { %1214 = vmatprep.mubr.f32.mxu1 %v2722_v3 }
 0x594   : > { %2068 = vmatmul.mubr.msk.f32.gmra.mrb[6].mxu1 %vm852_vm4, %v1105_v15 }
 0x595   : > { %1944 = vmatprep.mubr.f32.mxu1 %v2722_v3 }
 0x598   : > { %v1136_v40 = vpop.permute.xlu1 %1135 }
 0x5ea   : > { %v2442_v59 = vpop.permute.xlu0 %2441 }
 0x5eb   : > { %v2443_v62 = vunpack.i.l.bf16 %v2442_v59  ;;  %v2444_v6 = vunpack.i.h.bf16 %v2442_v59 }
 0x663   : > { %v1210_v31 = vpop.f32.mrb[4].mxu1 }
 0x664   : > { %v1211_v32 = vadd.f32 %v1210_v31, %v1131_v30  ;;  %v1212_v33 = vpop.f32.mrb[5].mxu1 }
 0x665   : > { %v1213_v34 = vadd.f32 %v1212_v33, %v1131_v30 }
 0x666   : > { %v3166_v39 = vadd.f32 %v1211_v32, %v2992_v23 }
 0x667   : > { %v3169_v41 = vadd.f32 %v1213_v34, %v2995_v25  ;;  %v1216_v43 = vpop.f32.mrb[6].mxu1 }
 0x668   : > { %vm1225_vm11 = vcmp.ge.f32.partialorder %v3166_v39, 0.0  ;;  %v1229_v45 = vmul.f32 0.1, %v3166_v39  ;;  %v1217_v46 = vadd.f32 %v1216_v43, %v1136_v40  ;;  %v1218_v47 = vpop.f32.mrb[7].mxu1 }
 0x669   : > { %vm1226_vm12 = vcmp.ge.f32.partialorder %v3169_v41, 0.0  ;;  %v1230_v48 = vmul.f32 0.1, %v3169_v41  ;;  %v1219_v49 = vadd.f32 %v1218_v47, %v1136_v40 }
 0x66a   : > { %v3176_v50 = vsel %vm1225_vm11, %v3166_v39, %v1229_v45  ;;  %v3179_v23 = vadd.f32 %v1217_v46, %v3005_v12 }
 0x66b   : > { %v3182_v25 = vsel %vm1226_vm12, %v3169_v41, %v1230_v48  ;;  %v3185_v13 = vadd.f32 %v1219_v49, %v3011_v38 }
 0x66c   : > { %vm1227_vm13 = vcmp.ge.f32.partialorder %v3179_v23, 0.0  ;;  %v1231_v42 = vmul.f32 0.1, %v3179_v23  ;;  %v2450_v44 = vpack.i.bf16 %v3182_v25, %v3176_v50  ;;  %v2485_v36 = vpack.i.bf16 %v3212_v55, %v3182_v25 }
 0x66d   : > { %vm1228_vm14 = vcmp.ge.f32.partialorder %v3185_v13, 0.0  ;;  %v1232_v51 = vmul.f32 0.1, %v3185_v13 }
 0x66e   : > { %v3194_v12 = vsel %vm1227_vm13, %v3179_v23, %v1231_v42  ;;  %2451 = vrot.lane.b32.xlu1 %v2450_v44, %s2725_s29  ;;  %2446 = vrot.lane.b32.xlu0 %v2450_v44, %s2727_s7 }
 0x66f   : > { %v3199_v38 = vsel %vm1228_vm14, %v3185_v13, %v1232_v51  ;;  %v2158_v52 = vpack.c.bf16 %v3194_v12, %v3176_v50  ;;  %v2490_v27 = vpack.i.bf16 %v3194_v12, %v3176_v50 }
 0x670   : > { %v2455_v53 = vpack.i.bf16 %v3199_v38, %v3194_v12  ;;  %v2156_v54 = vpack.c.bf16 %v3199_v38, %v3182_v25  ;;  %v2500_v56 = vpack.i.bf16 %v3219_v26, %v3199_v38 }
 0x672   : > { %2456 = vrot.lane.b32.xlu1 %v2455_v53, %s2727_s7  ;;  %2466 = vrot.lane.b32.xlu0 %v2450_v44, %s2723_s22 }
 0x676   : > { %2461 = vrot.lane.b32.xlu1 %v3161_v28, %s2725_s29  ;;  %2471 = vrot.lane.b32.xlu0 %v2455_v53, %s2725_s29 }
 0x67a   : > { %2481 = vrot.lane.b32.xlu1 %v2455_v53, %s2723_s22  ;;  %2476 = vrot.lane.b32.xlu0 %v3161_v28, %s2723_s22 }
 0x67e   : > { %2486 = vrot.lane.b32.xlu1 %v2485_v36, %s2724_s26  ;;  %2496 = vrot.lane.b32.xlu0 %v2485_v36, %s2726_s30 }
 0x682   : > { %2491 = vrot.lane.b32.xlu1 %v2490_v27, %s2724_s26  ;;  %2501 = vrot.lane.b32.xlu0 %v2500_v56, %s2724_s26 }
 0x686   : > { %2511 = vrot.lane.b32.xlu1 %v2500_v56, %s2726_s30  ;;  %2506 = vrot.lane.b32.xlu0 %v2490_v27, %s2726_s30 }
 0x68a   : > { %2516 = vrot.lane.b32.xlu1 %v2485_v36, %s2728_s8  ;;  %2521 = vrot.lane.b32.xlu0 %v2500_v56, %s2728_s8 }
 0x68e   : > { %2526 = vrot.lane.b32.xlu1 %v2490_v27, %s2728_s8  ;;  %1500 = vperm.xlu0 %2258, %v1468_v57  }
 0x692   : > { %1505 = vperm.xlu1 %2259, %v1469_v58   ;;  %2531 = vrot.lane.b32.xlu0 %v3161_v28, %s2727_s7 }
 0x6e0   : > { %v2452_v60 = vpop.permute.xlu1 %2451  ;;  %v2447_v61 = vpop.permute.xlu0 %2446 }
 0x6e1   : > { %v2449_v63 = vunpack.i.h.bf16 %v2447_v61  ;;  %v2448_v0 = vunpack.i.l.bf16 %v2447_v61  ;;  %v2454_v9 = vunpack.i.h.bf16 %v2452_v60  ;;  %v2453_v14 = vunpack.i.l.bf16 %v2452_v60 }
 0x6e3   : > { %v1265_v16 = vsel %vm228_vm0, %v2443_v62, %v2448_v0  ;;  %v1266_v19 = vsel %vm228_vm0, %v2448_v0, %v2449_v63  ;;  %v1302_v15 = vsel %vm688_vm2, %v2453_v14, %v2454_v9 }
 0x6e4   : > { %v2457_v2 = vpop.permute.xlu1 %2456  ;;  %v2467_v4 = vpop.permute.xlu0 %2466 }
 0x6e5   : > { %v2459_v7 = vunpack.i.h.bf16 %v2457_v2  ;;  %v2458_v8 = vunpack.i.l.bf16 %v2457_v2  ;;  %v2469_v10 = vunpack.i.h.bf16 %v2467_v4  ;;  %v2468_v22 = vunpack.i.l.bf16 %v2467_v4 }
 0x6e7   : > { %v1267_v18 = vsel %vm228_vm0, %v2444_v6, %v2458_v8  ;;  %v1268_v5 = vsel %vm228_vm0, %v2458_v8, %v2459_v7  ;;  %v1338_v42 = vsel %vm271_vm6, %v2468_v22, %v2469_v10 }
 0x6e8   : > { %v2146_v11 = vpack.c.bf16 %v1267_v18, %v1265_v16  ;;  %v2462_v17 = vpop.permute.xlu1 %2461  ;;  %v2472_v37 = vpop.permute.xlu0 %2471  ;;  %v2144_v29 = vpack.c.bf16 %v1268_v5, %v1266_v19 }
 0x6e9   : > { %v2464_v20 = vunpack.i.h.bf16 %v2462_v17  ;;  %v2463_v35 = vunpack.i.l.bf16 %v2462_v17  ;;  %v2474_v21 = vunpack.i.h.bf16 %v2472_v37  ;;  %v2473_v1 = vunpack.i.l.bf16 %v2472_v37 }
 0x6ea   : > { %2145 = vmatprep.subr.bf16.mxu0 %v2144_v29 }
 0x6eb   : > { %v1301_v24 = vsel %vm688_vm2, %v2463_v35, %v2453_v14  ;;  %v1303_v30 = vsel %vm688_vm2, %v2464_v20, %v2473_v1  ;;  %2147 = vmatpush1.bf16.msra.mxu0 %v2146_v11  ;;  %v1304_v31 = vsel %vm688_vm2, %v2473_v1, %v2474_v21 }
 0x6ec   : > { %v2150_v32 = vpack.c.bf16 %v1303_v30, %v1301_v24  ;;  %v2482_v33 = vpop.permute.xlu1 %2481  ;;  %v2477_v34 = vpop.permute.xlu0 %2476  ;;  %v2148_v40 = vpack.c.bf16 %v1304_v31, %v1302_v15 }
 0x6ed   : > { %v2484_v43 = vunpack.i.h.bf16 %v2482_v33  ;;  %v2483_v45 = vunpack.i.l.bf16 %v2482_v33  ;;  %v2479_v46 = vunpack.i.h.bf16 %v2477_v34  ;;  %v2478_v47 = vunpack.i.l.bf16 %v2477_v34 }
 0x6ee   : > { %2149 = vmatprep.subr.bf16.mxu0 %v2148_v40  ;;  %v1466_v40 = vld [vmem:[%s3424_s1 + $0x40] sm:$0xff] }
 0x6ef   : > { %v1339_v48 = vsel %vm271_vm6, %v2479_v46, %v2483_v45  ;;  %v1337_v49 = vsel %vm271_vm6, %v2478_v47, %v2468_v22  ;;  %2151 = vmatpush1.bf16.msra.mxu0 %v2150_v32  ;;  %v1340_v44 = vsel %vm271_vm6, %v2483_v45, %v2484_v43  ;;  %v1467_v43 = vld [vmem:[%s3424_s1 + $0x48] sm:$0xff] }
 0x6f0   : > { %v2154_v51 = vpack.c.bf16 %v1339_v48, %v1337_v49  ;;  %v2487_v53 = vpop.permute.xlu1 %2486  ;;  %v2497_v36 = vpop.permute.xlu0 %2496  ;;  %v2152_v27 = vpack.c.bf16 %v1340_v44, %v1338_v42 }
 0x6f1   : > { %v2489_v56 = vunpack.i.h.bf16 %v2487_v53  ;;  %v2488_v57 = vunpack.i.l.bf16 %v2487_v53  ;;  %v2499_v0 = vunpack.i.h.bf16 %v2497_v36  ;;  %v2498_v2 = vunpack.i.l.bf16 %v2497_v36 }
 0x6f2   : > { %2153 = vmatprep.subr.bf16.mxu0 %v2152_v27 }
 0x6f3   : > { %2155 = vmatpush1.bf16.msra.mxu0 %v2154_v51  ;;  %v1382_v7 = vsel %vm316_vm7, %v2488_v57, %v2489_v56  ;;  %v1418_v50 = vsel %vm805_vm3, %v2498_v2, %v2499_v0 }
 0x6f4   : > { %v2492_v58 = vpop.permute.xlu1 %2491  ;;  %v2502_v59 = vpop.permute.xlu0 %2501  ;;  %2157 = vmatprep.subr.bf16.mxu0 %v2156_v54 }
 0x6f5   : > { %v2494_v60 = vunpack.i.h.bf16 %v2492_v58  ;;  %v2493_v61 = vunpack.i.l.bf16 %v2492_v58  ;;  %v2504_v62 = vunpack.i.h.bf16 %v2502_v59  ;;  %v2503_v63 = vunpack.i.l.bf16 %v2502_v59 }
 0x6f7   : > { %v1381_v4 = vsel %vm316_vm7, %v2493_v61, %v2488_v57  ;;  %v1383_v6 = vsel %vm316_vm7, %v2494_v60, %v2503_v63  ;;  %2159 = vmatpush1.bf16.msra.mxu0 %v2158_v52  ;;  %v1384_v8 = vsel %vm316_vm7, %v2503_v63, %v2504_v62 }
 0x6f8   : > { %v2162_v25 = vpack.c.bf16 %v1383_v6, %v1381_v4  ;;  %v2512_v38 = vpop.permute.xlu1 %2511  ;;  %v2507_v54 = vpop.permute.xlu0 %2506  ;;  %v2160_v9 = vpack.c.bf16 %v1384_v8, %v1382_v7 }
 0x6f9   : > { %v2514_v14 = vunpack.i.h.bf16 %v2512_v38  ;;  %v2513_v16 = vunpack.i.l.bf16 %v2512_v38  ;;  %v2509_v18 = vunpack.i.h.bf16 %v2507_v54  ;;  %v2508_v19 = vunpack.i.l.bf16 %v2507_v54 }
 0x6fa   : > { %2161 = vmatprep.subr.bf16.mxu0 %v2160_v9 }
 0x6fb   : > { %v1419_v5 = vsel %vm805_vm3, %v2509_v18, %v2513_v16  ;;  %v1417_v11 = vsel %vm805_vm3, %v2508_v19, %v2498_v2  ;;  %2163 = vmatpush1.bf16.msra.mxu0 %v2162_v25  ;;  %v1420_v12 = vsel %vm805_vm3, %v2513_v16, %v2514_v14 }
 0x6fc   : > { %v2166_v52 = vpack.c.bf16 %v1419_v5, %v1417_v11  ;;  %v2517_v17 = vpop.permute.xlu1 %2516  ;;  %v2522_v37 = vpop.permute.xlu0 %2521  ;;  %v2164_v29 = vpack.c.bf16 %v1420_v12, %v1418_v50 }
 0x6fd   : > { %v2519_v20 = vunpack.i.h.bf16 %v2517_v17  ;;  %v2518_v35 = vunpack.i.l.bf16 %v2517_v17  ;;  %v2524_v21 = vunpack.i.h.bf16 %v2522_v37  ;;  %v2523_v1 = vunpack.i.l.bf16 %v2522_v37 }
 0x6fe   : > { %2165 = vmatprep.subr.bf16.mxu0 %v2164_v29 }
 0x6ff   : > { %2167 = vmatpush1.bf16.msra.mxu0 %v2166_v52  ;;  %v1455_v10 = vsel %vm1453_vm15, %v2518_v35, %v2519_v20  ;;  %v1457_v15 = vsel %vm1453_vm15, %v2523_v1, %v2524_v21 }
 0x700   : > { %v2527_v22 = vpop.permute.xlu1 %2526  ;;  %v2168_v24 = vpack.c.bf16 %v1457_v15, %v1455_v10 }
 0x701   : > { %v2529_v30 = vunpack.i.h.bf16 %v2527_v22  ;;  %v2528_v31 = vunpack.i.l.bf16 %v2527_v22 }
 0x702   : > { %2169 = vmatprep.subr.bf16.mxu0 %v2168_v24 }
 0x703   : > { %v1454_v32 = vsel %vm1453_vm15, %v2528_v31, %v2518_v35  ;;  %v1456_v33 = vsel %vm1453_vm15, %v2529_v30, %v2523_v1 }
 0x704   : > { %v2170_v34 = vpack.c.bf16 %v1456_v33, %v1454_v32 }
 0x706   : > { %2171 = vmatpush1.bf16.msra.mxu0 %v2170_v34 }
 0x709   : > { %2069 = vmatmul.mubr.msk.f32.vlgmr.msra.gmra.mrb[8].mxu0 %vm1508_vm1, %v1466_v40 }
 0x70a   : > { %1585 = vmatprep.mubr.f32.mxu0 %v2722_v3 }
 0x70d   : > { %2070 = vmatmul.mubr.msk.f32.gmra.mrb[10].mxu0 %vm1508_vm1, %v1467_v43  ;;  %v1501_v45 = vpop.permute.xlu0 %1500 }
 0x711   : > { %v1506_v44 = vpop.permute.xlu1 %1505 }
 0x7dc   : > { %v1581_v46 = vpop.f32.mrb[8].mxu0 }
 0x7dd   : > { %v1582_v47 = vadd.f32 %v1581_v46, %v1501_v45  ;;  %v1583_v48 = vpop.f32.mrb[9].mxu0 }
 0x7de   : > { %v1584_v49 = vadd.f32 %v1583_v48, %v1501_v45 }
 0x7df   : > { %vm1592_vm4 = vcmp.ge.f32.partialorder %v1582_v47, 0.0  ;;  %v1596_v42 = vmul.f32 0.1, %v1582_v47 }
 0x7e0   : > { %vm1593_vm5 = vcmp.ge.f32.partialorder %v1584_v49, 0.0  ;;  %v1597_v51 = vmul.f32 0.1, %v1584_v49  ;;  %v1587_v53 = vpop.f32.mrb[10].mxu0 }
 0x7e1   : > { %v3281_v36 = vsel %vm1592_vm4, %v1582_v47, %v1596_v42  ;;  %v1588_v27 = vadd.f32 %v1587_v53, %v1506_v44  ;;  %v1589_v56 = vpop.f32.mrb[11].mxu0 }
 0x7e2   : > { %v3283_v57 = vsel %vm1593_vm5, %v1584_v49, %v1597_v51  ;;  %v1590_v58 = vadd.f32 %v1589_v56, %v1506_v44 }
 0x7e3   : > { %vm1594_vm8 = vcmp.ge.f32.partialorder %v1588_v27, 0.0  ;;  %v1598_v59 = vmul.f32 0.1, %v1588_v27  ;;  %v2540_v60 = vpack.i.bf16 %v3283_v57, %v3281_v36  ;;  %v2575_v7 = vpack.i.bf16 %v3212_v55, %v3283_v57  ;;  %v1835_v55 = vld [vmem:[%s3425_s2 + $0x78] sm:$0xff] }
 0x7e4   : > { %vm1595_vm9 = vcmp.ge.f32.partialorder %v1590_v58, 0.0  ;;  %v1599_v61 = vmul.f32 0.1, %v1590_v58 }
 0x7e5   : > { %v3287_v62 = vsel %vm1594_vm8, %v1588_v27, %v1598_v59  ;;  %2541 = vrot.lane.b32.xlu1 %v2540_v60, %s2725_s29  ;;  %2536 = vrot.lane.b32.xlu0 %v2540_v60, %s2727_s7 }
 0x7e6   : > { %v3291_v63 = vsel %vm1595_vm9, %v1590_v58, %v1599_v61  ;;  %v2580_v0 = vpack.i.bf16 %v3287_v62, %v3281_v36  ;;  %v2186_v2 = vpack.c.bf16 %v3287_v62, %v3281_v36 }
 0x7e7   : > { %v2545_v4 = vpack.i.bf16 %v3291_v63, %v3287_v62  ;;  %v2184_v6 = vpack.c.bf16 %v3291_v63, %v3283_v57  ;;  %v2590_v8 = vpack.i.bf16 %v3219_v26, %v3291_v63  ;;  %v2532_v26 = vpop.permute.xlu0 %2531 }
 0x7e8   : > { %v2533_v54 = vunpack.i.l.bf16 %v2532_v26  ;;  %v2534_v19 = vunpack.i.h.bf16 %v2532_v26 }
 0x7e9   : > { %2546 = vrot.lane.b32.xlu1 %v2545_v4, %s2727_s7  ;;  %2556 = vrot.lane.b32.xlu0 %v2540_v60, %s2723_s22 }
 0x7ed   : > { %2551 = vrot.lane.b32.xlu1 %v3161_v28, %s2725_s29  ;;  %2561 = vrot.lane.b32.xlu0 %v2545_v4, %s2725_s29 }
 0x7f1   : > { %2571 = vrot.lane.b32.xlu1 %v2545_v4, %s2723_s22  ;;  %2566 = vrot.lane.b32.xlu0 %v3161_v28, %s2723_s22  ;;  %v1834_v28 = vld [vmem:[%s3425_s2 + $0x70] sm:$0xff]  ;;  %s2656_s22 = scalar_lea.vmem %s2655_s11, 1024 }
 0x7f2   : > { %p2658_p10 = scmp.lt.s32.totalorder %s2656_s22, %s2650_s28 }
 0x7f4   : > { %p2659_p0 = por %p2658_p10, %p2657_p8 }
 0x7f5   : > { %2576 = vrot.lane.b32.xlu1 %v2575_v7, %s2724_s26  ;;  %2586 = vrot.lane.b32.xlu0 %v2575_v7, %s2726_s30 }
 0x7f6   : > { %p2660_p2 = pnand %p2659_p0, %p2653_p13 }
 0x7f9   : > { %2581 = vrot.lane.b32.xlu1 %v2580_v0, %s2724_s26  ;;  %2591 = vrot.lane.b32.xlu0 %v2590_v8, %s2724_s26 }
 0x7fd   : > { %2601 = vrot.lane.b32.xlu1 %v2590_v8, %s2726_s30  ;;  %2596 = vrot.lane.b32.xlu0 %v2580_v0, %s2726_s30 }
 0x801   : > { %2606 = vrot.lane.b32.xlu1 %v2575_v7, %s2728_s8  ;;  %2611 = vrot.lane.b32.xlu0 %v2590_v8, %s2728_s8 }
 0x805   : > { %2616 = vrot.lane.b32.xlu1 %v2580_v0, %s2728_s8  ;;  %1866 = vperm.xlu0 %2258, %v1834_v28  }
 0x809   : > { %1871 = vperm.xlu1 %2259, %v1835_v55  }
 0x857   : > { %v2542_v25 = vpop.permute.xlu1 %2541  ;;  %v2537_v38 = vpop.permute.xlu0 %2536 }
 0x858   : > { %v2539_v9 = vunpack.i.h.bf16 %v2537_v38  ;;  %v2538_v14 = vunpack.i.l.bf16 %v2537_v38  ;;  %v2544_v50 = vunpack.i.h.bf16 %v2542_v25  ;;  %v2543_v12 = vunpack.i.l.bf16 %v2542_v25 }
 0x85a   : > { %v1632_v52 = vsel %vm228_vm0, %v2533_v54, %v2538_v14  ;;  %v1633_v37 = vsel %vm228_vm0, %v2538_v14, %v2539_v9  ;;  %v1669_v31 = vsel %vm688_vm2, %v2543_v12, %v2544_v50 }
 0x85b   : > { %v2547_v16 = vpop.permute.xlu1 %2546  ;;  %v2557_v18 = vpop.permute.xlu0 %2556 }
 0x85c   : > { %v2549_v5 = vunpack.i.h.bf16 %v2547_v16  ;;  %v2548_v11 = vunpack.i.l.bf16 %v2547_v16  ;;  %v2559_v30 = vunpack.i.h.bf16 %v2557_v18  ;;  %v2558_v32 = vunpack.i.l.bf16 %v2557_v18 }
 0x85e   : > { %v1634_v17 = vsel %vm228_vm0, %v2534_v19, %v2548_v11  ;;  %v1635_v29 = vsel %vm228_vm0, %v2548_v11, %v2549_v5  ;;  %v1705_v27 = vsel %vm271_vm6, %v2558_v32, %v2559_v30 }
 0x85f   : > { %v2174_v20 = vpack.c.bf16 %v1634_v17, %v1632_v52  ;;  %v2552_v35 = vpop.permute.xlu1 %2551  ;;  %v2562_v21 = vpop.permute.xlu0 %2561  ;;  %v2172_v1 = vpack.c.bf16 %v1635_v29, %v1633_v37 }
 0x860   : > { %v2554_v10 = vunpack.i.h.bf16 %v2552_v35  ;;  %v2553_v15 = vunpack.i.l.bf16 %v2552_v35  ;;  %v2564_v22 = vunpack.i.h.bf16 %v2562_v21  ;;  %v2563_v24 = vunpack.i.l.bf16 %v2562_v21 }
 0x861   : > { %2173 = vmatprep.subr.bf16.mxu1 %v2172_v1 }
 0x862   : > { %v1668_v33 = vsel %vm688_vm2, %v2553_v15, %v2543_v12  ;;  %v1670_v34 = vsel %vm688_vm2, %v2554_v10, %v2563_v24  ;;  %2175 = vmatpush1.bf16.msra.mxu1 %v2174_v20  ;;  %v1671_v40 = vsel %vm688_vm2, %v2563_v24, %v2564_v22 }
 0x863   : > { %v2178_v43 = vpack.c.bf16 %v1670_v34, %v1668_v33  ;;  %v2572_v45 = vpop.permute.xlu1 %2571  ;;  %v2567_v46 = vpop.permute.xlu0 %2566  ;;  %v2176_v47 = vpack.c.bf16 %v1671_v40, %v1669_v31 }
 0x864   : > { %v2574_v48 = vunpack.i.h.bf16 %v2572_v45  ;;  %v2573_v49 = vunpack.i.l.bf16 %v2572_v45  ;;  %v2569_v42 = vunpack.i.h.bf16 %v2567_v46  ;;  %v2568_v44 = vunpack.i.l.bf16 %v2567_v46  ;;  %v1833_v45 = vld [vmem:[%s3424_s1 + $0x58] sm:$0xff] }
 0x865   : > { %2177 = vmatprep.subr.bf16.mxu1 %v2176_v47 }
 0x866   : > { %v1706_v51 = vsel %vm271_vm6, %v2569_v42, %v2573_v49  ;;  %v1704_v53 = vsel %vm271_vm6, %v2568_v44, %v2558_v32  ;;  %2179 = vmatpush1.bf16.msra.mxu1 %v2178_v43  ;;  %v1707_v56 = vsel %vm271_vm6, %v2573_v49, %v2574_v48  ;;  %v1832_v43 = vld [vmem:[%s3424_s1 + $0x50] sm:$0xff] }
 0x867   : > { %v2182_v58 = vpack.c.bf16 %v1706_v51, %v1704_v53  ;;  %v2577_v59 = vpop.permute.xlu1 %2576  ;;  %v2587_v60 = vpop.permute.xlu0 %2586  ;;  %v2180_v61 = vpack.c.bf16 %v1707_v56, %v1705_v27 }
 0x868   : > { %v2579_v0 = vunpack.i.h.bf16 %v2577_v59  ;;  %v2578_v4 = vunpack.i.l.bf16 %v2577_v59  ;;  %v2589_v38 = vunpack.i.h.bf16 %v2587_v60  ;;  %v2588_v54 = vunpack.i.l.bf16 %v2587_v60 }
 0x869   : > { %2181 = vmatprep.subr.bf16.mxu1 %v2180_v61 }
 0x86a   : > { %2183 = vmatpush1.bf16.msra.mxu1 %v2182_v58  ;;  %v1749_v16 = vsel %vm316_vm7, %v2578_v4, %v2579_v0  ;;  %v1785_v36 = vsel %vm805_vm3, %v2588_v54, %v2589_v38 }
 0x86b   : > { %v2582_v7 = vpop.permute.xlu1 %2581  ;;  %v2592_v8 = vpop.permute.xlu0 %2591  ;;  %2185 = vmatprep.subr.bf16.mxu1 %v2184_v6 }
 0x86c   : > { %v2584_v28 = vunpack.i.h.bf16 %v2582_v7  ;;  %v2583_v55 = vunpack.i.l.bf16 %v2582_v7  ;;  %v2594_v26 = vunpack.i.h.bf16 %v2592_v8  ;;  %v2593_v25 = vunpack.i.l.bf16 %v2592_v8 }
 0x86e   : > { %v1748_v9 = vsel %vm316_vm7, %v2583_v55, %v2578_v4  ;;  %v1750_v14 = vsel %vm316_vm7, %v2584_v28, %v2593_v25  ;;  %2187 = vmatpush1.bf16.msra.mxu1 %v2186_v2  ;;  %v1751_v18 = vsel %vm316_vm7, %v2593_v25, %v2594_v26 }
 0x86f   : > { %v2190_v57 = vpack.c.bf16 %v1750_v14, %v1748_v9  ;;  %v2602_v63 = vpop.permute.xlu1 %2601  ;;  %v2597_v6 = vpop.permute.xlu0 %2596  ;;  %v2188_v19 = vpack.c.bf16 %v1751_v18, %v1749_v16 }
 0x870   : > { %v2604_v5 = vunpack.i.h.bf16 %v2602_v63  ;;  %v2603_v11 = vunpack.i.l.bf16 %v2602_v63  ;;  %v2599_v50 = vunpack.i.h.bf16 %v2597_v6  ;;  %v2598_v12 = vunpack.i.l.bf16 %v2597_v6 }
 0x871   : > { %2189 = vmatprep.subr.bf16.mxu1 %v2188_v19 }
 0x872   : > { %v1786_v52 = vsel %vm805_vm3, %v2599_v50, %v2603_v11  ;;  %v1784_v17 = vsel %vm805_vm3, %v2598_v12, %v2588_v54  ;;  %2191 = vmatpush1.bf16.msra.mxu1 %v2190_v57  ;;  %v1787_v62 = vsel %vm805_vm3, %v2603_v11, %v2604_v5 }
 0x873   : > { %v2194_v2 = vpack.c.bf16 %v1786_v52, %v1784_v17  ;;  %v2607_v37 = vpop.permute.xlu1 %2606  ;;  %v2612_v29 = vpop.permute.xlu0 %2611  ;;  %v2192_v20 = vpack.c.bf16 %v1787_v62, %v1785_v36 }
 0x874   : > { %v2609_v35 = vunpack.i.h.bf16 %v2607_v37  ;;  %v2608_v21 = vunpack.i.l.bf16 %v2607_v37  ;;  %v2614_v1 = vunpack.i.h.bf16 %v2612_v29  ;;  %v2613_v10 = vunpack.i.l.bf16 %v2612_v29 }
 0x875   : > { %2193 = vmatprep.subr.bf16.mxu1 %v2192_v20 }
 0x876   : > { %2195 = vmatpush1.bf16.msra.mxu1 %v2194_v2  ;;  %v1821_v15 = vsel %vm1453_vm15, %v2608_v21, %v2609_v35  ;;  %v1823_v22 = vsel %vm1453_vm15, %v2613_v10, %v2614_v1 }
 0x877   : > { %v2617_v24 = vpop.permute.xlu1 %2616  ;;  %v2196_v30 = vpack.c.bf16 %v1823_v22, %v1821_v15 }
 0x878   : > { %v2619_v31 = vunpack.i.h.bf16 %v2617_v24  ;;  %v2618_v32 = vunpack.i.l.bf16 %v2617_v24 }
 0x879   : > { %2197 = vmatprep.subr.bf16.mxu1 %v2196_v30 }
 0x87a   : > { %v1820_v33 = vsel %vm1453_vm15, %v2618_v32, %v2608_v21  ;;  %v1822_v34 = vsel %vm1453_vm15, %v2619_v31, %v2613_v10 }
 0x87b   : > { %v2198_v40 = vpack.c.bf16 %v1822_v34, %v1820_v33 }
 0x87d   : > { %2199 = vmatpush1.bf16.msra.mxu1 %v2198_v40 }
 0x880   : > { %2071 = vmatmul.mubr.msk.f32.vlgmr.msra.gmra.mrb[8].mxu1 %vm1508_vm1, %v1832_v43 }
 0x881   : > { %1950 = vmatprep.mubr.f32.mxu1 %v2722_v3 }
 0x884   : > { %2072 = vmatmul.mubr.msk.f32.gmra.mrb[10].mxu1 %vm1508_vm1, %v1833_v45  ;;  %v1867_v46 = vpop.permute.xlu0 %1866 }
 0x888   : > { %v1872_v51 = vpop.permute.xlu1 %1871 }
 0x953   : > { %v1946_v47 = vpop.f32.mrb[8].mxu1 }
 0x954   : > { %v1947_v48 = vadd.f32 %v1946_v47, %v1867_v46  ;;  %v1948_v49 = vpop.f32.mrb[9].mxu1 }
 0x955   : > { %v1949_v42 = vadd.f32 %v1948_v49, %v1867_v46 }
 0x956   : > { %v1957_v44 = vadd.f32 %v1947_v48, %v3166_v39 }
 0x957   : > { %v1958_v3 = vadd.f32 %v1949_v42, %v3169_v41  ;;  %v1952_v53 = vpop.f32.mrb[10].mxu1 }
 0x958   : > { %1961 = vst [vmem:[%s188_s23] sm:$0xff] %v1957_v44  ;;  %v1953_v27 = vadd.f32 %v1952_v53, %v1872_v51  ;;  %v1954_v56 = vpop.f32.mrb[11].mxu1 }
 0x959   : > { %1962 = vst [vmem:[%s188_s23 + $0x8] sm:$0xff] %v1958_v3  ;;  %v1955_v39 = vadd.f32 %v1954_v56, %v1872_v51 }
 0x95a   : > { %v1959_v58 = vadd.f32 %v1953_v27, %v3179_v23 }
 0x95b   : > { %v1960_v41 = vadd.f32 %v1955_v39, %v3185_v13 }
 0x95c   : > { %1963 = vst [vmem:[%s188_s23 + $0x10] sm:$0xff] %v1959_v58 }
 0x95d   : > { %1964 = vst [vmem:[%s188_s23 + $0x18] sm:$0xff] %v1960_v41 }
 0x95e   : > { %2663 = shalt.err (!%p2660_p2)
}
 0x95f   : > { %s2664_s29 = scalar_lea.hbm %s3378_s27, 512  ;;  %s2668_s26 = scalar_lea.hbm %s3426_s3, 1024 }
 0x960   : > { %p2665_p4 = scmp.ne.s32.totalorder %s3378_s27, %s2664_s29  ;;  %p2669_p9 = scmp.lt.u32.totalorder %s3378_s27, %s3426_s3 }
 0x961   : > { %p2670_p1 = scmp.lt.u32.totalorder %s2668_s26, %s2664_s29  ;;  %p2672_p6 = scmp.lt.u32.totalorder %s2664_s29, %s3378_s27 }
 0x962   : > { %p2666_p5 = pnand %p2665_p4, %p3433_p11 }
 0x963   : > { %p2671_p3 = por %p2670_p1, %p2669_p9 }
 0x964   : > { %p2667_p7 = pneg %p2666_p5 }
 0x965   : > { %p2673_p12 = por %p2672_p6, %p2671_p3 }
 0x967   : > { %p2674_p13 = pnand %p2673_p12, %p2667_p7 }
 0x969   : > { %2677 = shalt.err (!%p2674_p13)
}
 0x96a   : > { %s2730_s8 = smov 256   ;;  %s2731_s23 = smov 16  }
 0x96b   : > { %2202 = dma.vmem_to_hbm [thread:$0]  (%p3433_p11), %s3372_s17, 512, %s3378_s27, %s1966_s16, %s2730_s8, %s2730_s8, %s2731_s23  }
 0x96c PF: > { %s1994_s19 = sand.u32 1, %s2704_s12   ;;  %p3434_p8 = scmp.ne.s32.totalorder %s3431_s25, 0 }
 0x96d   : > { %p3435_p10 = scmp.ge.s32.totalorder %s2716_s15, 2  ;;  %s1995_s9 = scalar_lea.sflag [#allocation6], %s1994_s19 }
 0x96f   : > { %p2209_p0 = pnand %p3435_p10, %p3434_p8 }
 0x971   : > { %2699 = dma.done.wait (!%p2209_p0), %s1995_s9, 512  }
 0x972   : > { %2701 = vsyncadd (!%p2209_p0), %s1995_s9, 4294966784  ;;  %p16_p2 = scmp.ge.s32.totalorder %s2777_s18, 4   ;;  %s3436_s12 = smov %s2708_s13 }
 0x973   : > { %s3437_s13 = smov %s2712_s14  ;;  %s3438_s14 = smov %s2789_s21 }
 0x974   : > { %s3439_s15 = smov %s2777_s18  ;;  %18 = sbr.rel (!%p16_p2) target bundleno = 5 (0x5), region = 77 }
 0x97b   :  { %2000 = vsyncpa [#allocation5], 1 }
 0x97c   :  { %2002 = vsyncpa [#allocation5 + $0x1], 1 }
 0x97d   :  { %2003 = vsyncpa [#allocation6], 1 }
 0x97e   :  { %2005 = vsyncpa [#allocation6 + $0x1], 1 }

</bundles_post_ra>
